<compile_context>
chip_gen: v6e
topology: v6e:2x2x1
jax: 0.10.0
libtpu: 0.0.40
codegen_flags: <defaults>
</compile_context>

<pallas_src>
import jax
import jax.numpy as jnp
from jax import lax
from jax.experimental import pallas as pl
from jax.experimental.pallas import tpu as pltpu

_EPS = 1e-5
_TM_TARGET = 1024                     # spatial rows per tile
_VMEM_LIMIT = 32 * 1024 * 1024        # raises v5e's 16 MiB default, safe on v6e/v7x


def _round_up(x, m):
    return (x + m - 1) // m * m


# ---------------------------------------------------------------------------
# Pass 1: conv tile matmul (bf16 x bf16 -> f32) + per-tile channel stats.
# ---------------------------------------------------------------------------
def _conv_stats_kernel(p_ref, w_ref, y_ref, s_ref):
    # p_ref: (TM, Kp) bf16 ; w_ref: (Kp, Cp) bf16
    # y_ref: (TM, Cp) f32  ; s_ref: (1, 1, 2, Cp) f32 partial (sum, sumsq)
    y = jnp.dot(p_ref[...], w_ref[...], preferred_element_type=jnp.float32)
    y_ref[...] = y
    s1 = jnp.sum(y, axis=0, keepdims=True)          # (1, Cp)
    s2 = jnp.sum(y * y, axis=0, keepdims=True)      # (1, Cp)
    s_ref[0, 0] = jnp.concatenate([s1, s2], axis=0)


def _conv_stats_pallas(patches, w_mat, tm):
    n, m_pad, kp = patches.shape
    cp = w_mat.shape[1]
    n_tiles = m_pad // tm
    return pl.pallas_call(
        _conv_stats_kernel,
        out_shape=(
            jax.ShapeDtypeStruct((n, m_pad, cp), jnp.float32),
            jax.ShapeDtypeStruct((n, n_tiles, 2, cp), jnp.float32),
        ),
        grid=(n, n_tiles),
        in_specs=[
            pl.BlockSpec((None, tm, kp), lambda i, j: (i, j, 0)),
            pl.BlockSpec((kp, cp), lambda i, j: (0, 0)),
        ],
        out_specs=(
            pl.BlockSpec((None, tm, cp), lambda i, j: (i, j, 0)),
            pl.BlockSpec((1, 1, 2, cp), lambda i, j: (i, j, 0, 0)),
        ),
        compiler_params=pltpu.CompilerParams(
            dimension_semantics=("parallel", "parallel"),
            vmem_limit_bytes=_VMEM_LIMIT,
        ),
    )(patches, w_mat)


# ---------------------------------------------------------------------------
# Pass 2: InstanceNorm (no affine) + ReLU, per tile, using reduced stats.
# ---------------------------------------------------------------------------
def _make_norm_relu_kernel(inv_m):
    def kernel(y_ref, s_ref, o_ref):
        y = y_ref[...]                                   # (TM, Cp) f32
        s = s_ref[...]                                   # (2, Cp) f32
        mean = s[0:1, :] * inv_m
        var = jnp.maximum(s[1:2, :] * inv_m - mean * mean, 0.0)
        inv_std = lax.rsqrt(var + _EPS)
        o_ref[...] = jnp.maximum((y - mean) * inv_std, 0.0)
    return kernel


def _norm_relu_pallas(y, stats, m_true, tm):
    n, m_pad, cp = y.shape
    n_tiles = m_pad // tm
    return pl.pallas_call(
        _make_norm_relu_kernel(1.0 / float(m_true)),
        out_shape=jax.ShapeDtypeStruct((n, m_pad, cp), jnp.float32),
        grid=(n, n_tiles),
        in_specs=[
            pl.BlockSpec((None, tm, cp), lambda i, j: (i, j, 0)),
            pl.BlockSpec((None, 2, cp), lambda i, j: (i, 0, 0)),
        ],
        out_specs=pl.BlockSpec((None, tm, cp), lambda i, j: (i, j, 0)),
        compiler_params=pltpu.CompilerParams(
            dimension_semantics=("parallel", "parallel"),
            vmem_limit_bytes=_VMEM_LIMIT,
        ),
    )(y, stats)


# ---------------------------------------------------------------------------
# Wrapper-side glue: padding, bf16 im2col (K- and M-padded), weight reshape.
# ---------------------------------------------------------------------------
def _im2col_bf16(x_pad_nhwc, kh, kw, stride, k_pad, m_pad):
    n, h, w, c = x_pad_nhwc.shape
    oh = (h - kh) // stride + 1
    ow = (w - kw) // stride + 1
    taps = []
    for i in range(kh):
        for j in range(kw):
            taps.append(
                x_pad_nhwc[:, i:i + stride * (oh - 1) + 1:stride,
                           j:j + stride * (ow - 1) + 1:stride, :])
    k = kh * kw * c
    if k_pad > k:
        taps.append(jnp.zeros((n, oh, ow, k_pad - k), x_pad_nhwc.dtype))
    p = jnp.concatenate(taps, axis=-1).reshape(n, oh * ow, k_pad)
    if m_pad > oh * ow:
        p = jnp.pad(p, ((0, 0), (0, m_pad - oh * ow), (0, 0)))
    return p


def _conv_in_relu_block(x_nhwc, w_oihw, stride, pad, pad_mode):
    n = x_nhwc.shape[0]
    cout, cin, kh, kw = w_oihw.shape
    k = kh * kw * cin
    k_pad = _round_up(k, 128)
    c_pad = _round_up(cout, 128)

    xp = jnp.pad(x_nhwc, ((0, 0), (pad, pad), (pad, pad), (0, 0)),
                 mode=pad_mode).astype(jnp.bfloat16)
    oh = (xp.shape[1] - kh) // stride + 1
    ow = (xp.shape[2] - kw) // stride + 1
    m = oh * ow
    tm = min(_TM_TARGET, _round_up(m, 8))
    m_pad = _round_up(m, tm)

    patches = _im2col_bf16(xp, kh, kw, stride, k_pad, m_pad)      # (N, Mp, Kp) bf16

    # (O, I, KH, KW) -> (KH, KW, I, O) -> (K, O), zero-pad K and O, cast to bf16.
    w_mat = jnp.transpose(w_oihw, (2, 3, 1, 0)).reshape(k, cout)
    w_mat = jnp.pad(w_mat, ((0, k_pad - k), (0, c_pad - cout))).astype(jnp.bfloat16)

    y, partial = _conv_stats_pallas(patches, w_mat, tm)           # f32, f32
    stats = jnp.sum(partial, axis=1)                              # (N, 2, Cp) f32
    out = _norm_relu_pallas(y, stats, m, tm)                      # (N, Mp, Cp) f32
    return out[:, :m, :cout].reshape(n, oh, ow, cout)


@jax.jit
def content_encoder_forward(x_nchw, w1, b1, w2, b2, w3, b3):
    """Equivalent of ContentEncoder(...)(x, layers=[])[0]; NCHW in/out (f32).

    Conv biases are accepted for parameter parity but are mathematically no-ops:
    InstanceNorm2d without affine subtracts the per-channel spatial mean, which
    cancels any per-channel bias added before it.
    """
    del b1, b2, b3
    x = jnp.transpose(x_nchw, (0, 2, 3, 1))                       # NCHW -> NHWC
    y = _conv_in_relu_block(x, w1, stride=1, pad=3, pad_mode="reflect")
    y = _conv_in_relu_block(y, w2, stride=2, pad=1, pad_mode="constant")
    y = _conv_in_relu_block(y, w3, stride=2, pad=1, pad_mode="constant")
    return jnp.transpose(y, (0, 3, 1, 2))                         # NHWC -> NCHW


# ---------------------------------------------------------------------------
# Plain-JAX references (XLA convs) mirroring the PyTorch semantics.
# ---------------------------------------------------------------------------
def _reference_forward(x_nchw, w1, b1, w2, b2, w3, b3, cast_bf16):
    def conv(x, w, b, stride, padding):
        if cast_bf16:
            x = x.astype(jnp.bfloat16)
            w = w.astype(jnp.bfloat16)
        y = lax.conv_general_dilated(
            x, w, (stride, stride), padding,
            dimension_numbers=("NCHW", "OIHW", "NCHW"),
            preferred_element_type=jnp.float32)
        return y + b[None, :, None, None]

    def in_relu(y):
        mean = jnp.mean(y, axis=(2, 3), keepdims=True)
        var = jnp.mean((y - mean) ** 2, axis=(2, 3), keepdims=True)
        return jnp.maximum((y - mean) * lax.rsqrt(var + _EPS), 0.0)

    x = jnp.pad(x_nchw, ((0, 0), (0, 0), (3, 3), (3, 3)), mode="reflect")
    y = in_relu(conv(x, w1, b1, 1, "VALID"))
    y = in_relu(conv(y, w2, b2, 2, ((1, 1), (1, 1))))
    y = in_relu(conv(y, w3, b3, 2, ((1, 1), (1, 1))))
    return y


if __name__ == "__main__":
    # Small deterministic configuration: input_nc=3, ngf=16, n_downsampling=2.
    input_nc, ngf, n, h, w = 3, 16, 2, 16, 16

    key = jax.random.PRNGKey(0)
    kx, k1, k2, k3, kb1, kb2, kb3 = jax.random.split(key, 7)

    x = jax.random.normal(kx, (n, input_nc, h, w), dtype=jnp.float32)
    w1 = 0.1 * jax.random.normal(k1, (ngf, input_nc, 7, 7), dtype=jnp.float32)
    b1 = 0.1 * jax.random.normal(kb1, (ngf,), dtype=jnp.float32)
    w2 = 0.1 * jax.random.normal(k2, (ngf * 2, ngf, 3, 3), dtype=jnp.float32)
    b2 = 0.1 * jax.random.normal(kb2, (ngf * 2,), dtype=jnp.float32)
    w3 = 0.1 * jax.random.normal(k3, (ngf * 4, ngf * 2, 3, 3), dtype=jnp.float32)
    b3 = 0.1 * jax.random.normal(kb3, (ngf * 4,), dtype=jnp.float32)

    out = jax.block_until_ready(content_encoder_forward(x, w1, b1, w2, b2, w3, b3))
    assert out.shape == (n, ngf * 4, h // 4, w // 4), out.shape

    # Tight check vs a reference with the same intended numerics
    # (bf16 matmul operands, f32 accumulation, f32 IN/ReLU).
    ref_bf16 = jax.block_until_ready(
        _reference_forward(x, w1, b1, w2, b2, w3, b3, cast_bf16=True))
    err_bf16 = float(jnp.max(jnp.abs(out - ref_bf16)))
    assert err_bf16 < 5e-3, f"mismatch vs bf16-operand reference: {err_bf16}"

    # Loose sanity check vs the full-f32 reference (bf16 operands are intentional).
    ref_f32 = jax.block_until_ready(
        _reference_forward(x, w1, b1, w2, b2, w3, b3, cast_bf16=False))
    err_f32 = float(jnp.max(jnp.abs(out - ref_f32)))
    assert err_f32 < 5e-2, f"mismatch vs f32 reference: {err_f32}"

    print("KERNEL_OK")
</pallas_src>

<mosaic_0001>
module attributes {stable_mosaic.version = 11 : i64} {
  func.func @_conv_stats_kernel(%arg0: i32, %arg1: i32, %arg2: memref<1x256x256xbf16, #tpu.memory_space<vmem>>, %arg3: memref<256x128xbf16, #tpu.memory_space<vmem>>, %arg4: memref<1x256x128xf32, #tpu.memory_space<vmem>>, %arg5: memref<1x1x2x128xf32, #tpu.memory_space<vmem>>) attributes {dimension_semantics = [#tpu.dimension_semantics<parallel>, #tpu.dimension_semantics<parallel>], iteration_bounds = array<i64: 2, 1>, scalar_prefetch = 0 : i64, scratch_operands = 0 : i64, tpu.core_type = #tpu.core_type<tc>, window_params = [{transform_indices = @transform_0, window_bounds = array<i64: 1, 256, 256>}, {pipeline_mode = #tpu.pipeline_mode<synchronous>, transform_indices = @transform_1, window_bounds = array<i64: 256, 128>}, {transform_indices = @transform_2, window_bounds = array<i64: 1, 256, 128>}, {transform_indices = @transform_3, window_bounds = array<i64: 1, 1, 2, 128>}]} {
    %c0 = arith.constant 0 : index
    %c0_0 = arith.constant 0 : index
    %c0_1 = arith.constant 0 : index
    %0 = vector.load %arg2[%c0, %c0_0, %c0_1] : memref<1x256x256xbf16, #tpu.memory_space<vmem>>, vector<1x256x256xbf16>
    %1 = vector.shape_cast %0 : vector<1x256x256xbf16> to vector<256x256xbf16>
    %c0_2 = arith.constant 0 : index
    %c0_3 = arith.constant 0 : index
    %2 = vector.load %arg3[%c0_2, %c0_3] : memref<256x128xbf16, #tpu.memory_space<vmem>>, vector<256x128xbf16>
    %cst = arith.constant dense<0.000000e+00> : vector<256x128xf32>
    %3 = tpu.matmul %1, %2, %cst {dimension_numbers = #tpu.dot_dimension_numbers<[1], [0], [0], [1], [0, 0, 1, 1], [], []>} : vector<256x256xbf16>, vector<256x128xbf16>, vector<256x128xf32> -> vector<256x128xf32>
    %c0_4 = arith.constant 0 : index
    %c0_5 = arith.constant 0 : index
    %c0_6 = arith.constant 0 : index
    %4 = vector.load %arg4[%c0_4, %c0_5, %c0_6] : memref<1x256x128xf32, #tpu.memory_space<vmem>>, vector<1x256x128xf32>
    %5 = vector.shape_cast %4 : vector<1x256x128xf32> to vector<256x128xf32>
    %6 = vector.shape_cast %3 : vector<256x128xf32> to vector<1x256x128xf32>
    tpu.vector_store %arg4[%c0_4, %c0_5, %c0_6], %6 {strides = array<i32>} : memref<1x256x128xf32, #tpu.memory_space<vmem>>, vector<1x256x128xf32>,
    %cst_7 = arith.constant dense<0.000000e+00> : vector<128xf32>
    %7 = vector.multi_reduction <add>, %3, %cst_7 [0] : vector<256x128xf32> to vector<128xf32>
    %8 = vector.shape_cast %7 : vector<128xf32> to vector<1x128xf32>
    %9 = arith.mulf %3, %3 : vector<256x128xf32>
    %cst_8 = arith.constant dense<0.000000e+00> : vector<128xf32>
    %10 = vector.multi_reduction <add>, %9, %cst_8 [0] : vector<256x128xf32> to vector<128xf32>
    %11 = vector.shape_cast %10 : vector<128xf32> to vector<1x128xf32>
    %12 = tpu.concatenate %8, %11 in 0 : vector<1x128xf32>, vector<1x128xf32> -> vector<2x128xf32>
    %c0_9 = arith.constant 0 : index
    %c0_10 = arith.constant 0 : index
    %c0_11 = arith.constant 0 : index
    %c0_12 = arith.constant 0 : index
    %13 = vector.load %arg5[%c0_9, %c0_10, %c0_11, %c0_12] : memref<1x1x2x128xf32, #tpu.memory_space<vmem>>, vector<1x1x2x128xf32>
    %14 = vector.shape_cast %13 : vector<1x1x2x128xf32> to vector<2x128xf32>
    %15 = vector.shape_cast %12 : vector<2x128xf32> to vector<1x1x2x128xf32>
    tpu.vector_store %arg5[%c0_9, %c0_10, %c0_11, %c0_12], %15 {strides = array<i32>} : memref<1x1x2x128xf32, #tpu.memory_space<vmem>>, vector<1x1x2x128xf32>,
    return
  }
  func.func @transform_0(%arg0: i32, %arg1: i32) -> (i32, i32, i32) {
    %c0_i32 = arith.constant 0 : i32
    %c0_i32_0 = arith.constant 0 : i32
    return %arg0, %arg1, %c0_i32 : i32, i32, i32
  }
  func.func @transform_1(%arg0: i32, %arg1: i32) -> (i32, i32) {
    %c0_i32 = arith.constant 0 : i32
    %c0_i32_0 = arith.constant 0 : i32
    %c0_i32_1 = arith.constant 0 : i32
    return %c0_i32, %c0_i32_0 : i32, i32
  }
  func.func @transform_2(%arg0: i32, %arg1: i32) -> (i32, i32, i32) {
    %c0_i32 = arith.constant 0 : i32
    %c0_i32_0 = arith.constant 0 : i32
    return %arg0, %arg1, %c0_i32 : i32, i32, i32
  }
  func.func @transform_3(%arg0: i32, %arg1: i32) -> (i32, i32, i32, i32) {
    %c0_i32 = arith.constant 0 : i32
    %c0_i32_0 = arith.constant 0 : i32
    %c0_i32_1 = arith.constant 0 : i32
    return %arg0, %arg1, %c0_i32, %c0_i32_0 : i32, i32, i32, i32
  }
}

module attributes {stable_mosaic.version = 11 : i64} {
  func.func @kernel(%arg0: i32, %arg1: i32, %arg2: memref<1x256x128xf32, #tpu.memory_space<vmem>>, %arg3: memref<1x2x128xf32, #tpu.memory_space<vmem>>, %arg4: memref<1x256x128xf32, #tpu.memory_space<vmem>>) attributes {dimension_semantics = [#tpu.dimension_semantics<parallel>, #tpu.dimension_semantics<parallel>], iteration_bounds = array<i64: 2, 1>, scalar_prefetch = 0 : i64, scratch_operands = 0 : i64, tpu.core_type = #tpu.core_type<tc>, window_params = [{transform_indices = @transform_0, window_bounds = array<i64: 1, 256, 128>}, {transform_indices = @transform_1, window_bounds = array<i64: 1, 2, 128>}, {transform_indices = @transform_2, window_bounds = array<i64: 1, 256, 128>}]} {
    %c0 = arith.constant 0 : index
    %c0_0 = arith.constant 0 : index
    %c0_1 = arith.constant 0 : index
    %0 = vector.load %arg2[%c0, %c0_0, %c0_1] : memref<1x256x128xf32, #tpu.memory_space<vmem>>, vector<1x256x128xf32>
    %1 = vector.shape_cast %0 : vector<1x256x128xf32> to vector<256x128xf32>
    %c0_2 = arith.constant 0 : index
    %c0_3 = arith.constant 0 : index
    %c0_4 = arith.constant 0 : index
    %2 = vector.load %arg3[%c0_2, %c0_3, %c0_4] : memref<1x2x128xf32, #tpu.memory_space<vmem>>, vector<1x2x128xf32>
    %3 = vector.shape_cast %2 : vector<1x2x128xf32> to vector<2x128xf32>
    %4 = vector.extract_strided_slice %3 {offsets = [0, 0], sizes = [1, 128], strides = [1, 1]} : vector<2x128xf32> to vector<1x128xf32>
    %cst = arith.constant 3.906250e-03 : f32
    %5 = vector.broadcast %cst : f32 to vector<1x128xf32>
    %6 = arith.mulf %4, %5 : vector<1x128xf32>
    %7 = vector.extract_strided_slice %3 {offsets = [1, 0], sizes = [1, 128], strides = [1, 1]} : vector<2x128xf32> to vector<1x128xf32>
    %cst_5 = arith.constant 3.906250e-03 : f32
    %8 = vector.broadcast %cst_5 : f32 to vector<1x128xf32>
    %9 = arith.mulf %7, %8 : vector<1x128xf32>
    %10 = arith.mulf %6, %6 : vector<1x128xf32>
    %11 = arith.subf %9, %10 : vector<1x128xf32>
    %cst_6 = arith.constant 0.000000e+00 : f32
    %12 = vector.broadcast %cst_6 : f32 to vector<1x128xf32>
    %13 = arith.maximumf %11, %12 : vector<1x128xf32>
    %cst_7 = arith.constant 9.99999974E-6 : f32
    %14 = vector.broadcast %cst_7 : f32 to vector<1x128xf32>
    %15 = arith.addf %13, %14 : vector<1x128xf32>
    %16 = math.rsqrt %15 : vector<1x128xf32>
    %17 = vector.broadcast %6 : vector<1x128xf32> to vector<256x128xf32>
    %18 = arith.subf %1, %17 : vector<256x128xf32>
    %19 = vector.broadcast %16 : vector<1x128xf32> to vector<256x128xf32>
    %20 = arith.mulf %18, %19 : vector<256x128xf32>
    %cst_8 = arith.constant 0.000000e+00 : f32
    %21 = vector.broadcast %cst_8 : f32 to vector<256x128xf32>
    %22 = arith.maximumf %20, %21 : vector<256x128xf32>
    %c0_9 = arith.constant 0 : index
    %c0_10 = arith.constant 0 : index
    %c0_11 = arith.constant 0 : index
    %23 = vector.load %arg4[%c0_9, %c0_10, %c0_11] : memref<1x256x128xf32, #tpu.memory_space<vmem>>, vector<1x256x128xf32>
    %24 = vector.shape_cast %23 : vector<1x256x128xf32> to vector<256x128xf32>
    %25 = vector.shape_cast %22 : vector<256x128xf32> to vector<1x256x128xf32>
    tpu.vector_store %arg4[%c0_9, %c0_10, %c0_11], %25 {strides = array<i32>} : memref<1x256x128xf32, #tpu.memory_space<vmem>>, vector<1x256x128xf32>,
    return
  }
  func.func @transform_0(%arg0: i32, %arg1: i32) -> (i32, i32, i32) {
    %c0_i32 = arith.constant 0 : i32
    %c0_i32_0 = arith.constant 0 : i32
    return %arg0, %arg1, %c0_i32 : i32, i32, i32
  }
  func.func @transform_1(%arg0: i32, %arg1: i32) -> (i32, i32, i32) {
    %c0_i32 = arith.constant 0 : i32
    %c0_i32_0 = arith.constant 0 : i32
    %c0_i32_1 = arith.constant 0 : i32
    return %arg0, %c0_i32, %c0_i32_0 : i32, i32, i32
  }
  func.func @transform_2(%arg0: i32, %arg1: i32) -> (i32, i32, i32) {
    %c0_i32 = arith.constant 0 : i32
    %c0_i32_0 = arith.constant 0 : i32
    return %arg0, %arg1, %c0_i32 : i32, i32, i32
  }
}

module attributes {stable_mosaic.version = 11 : i64} {
  func.func @kernel(%arg0: i32, %arg1: i32, %arg2: memref<1x64x128xf32, #tpu.memory_space<vmem>>, %arg3: memref<1x2x128xf32, #tpu.memory_space<vmem>>, %arg4: memref<1x64x128xf32, #tpu.memory_space<vmem>>) attributes {dimension_semantics = [#tpu.dimension_semantics<parallel>, #tpu.dimension_semantics<parallel>], iteration_bounds = array<i64: 2, 1>, scalar_prefetch = 0 : i64, scratch_operands = 0 : i64, tpu.core_type = #tpu.core_type<tc>, window_params = [{transform_indices = @transform_0, window_bounds = array<i64: 1, 64, 128>}, {transform_indices = @transform_1, window_bounds = array<i64: 1, 2, 128>}, {transform_indices = @transform_2, window_bounds = array<i64: 1, 64, 128>}]} {
    %c0 = arith.constant 0 : index
    %c0_0 = arith.constant 0 : index
    %c0_1 = arith.constant 0 : index
    %0 = vector.load %arg2[%c0, %c0_0, %c0_1] : memref<1x64x128xf32, #tpu.memory_space<vmem>>, vector<1x64x128xf32>
    %1 = vector.shape_cast %0 : vector<1x64x128xf32> to vector<64x128xf32>
    %c0_2 = arith.constant 0 : index
    %c0_3 = arith.constant 0 : index
    %c0_4 = arith.constant 0 : index
    %2 = vector.load %arg3[%c0_2, %c0_3, %c0_4] : memref<1x2x128xf32, #tpu.memory_space<vmem>>, vector<1x2x128xf32>
    %3 = vector.shape_cast %2 : vector<1x2x128xf32> to vector<2x128xf32>
    %4 = vector.extract_strided_slice %3 {offsets = [0, 0], sizes = [1, 128], strides = [1, 1]} : vector<2x128xf32> to vector<1x128xf32>
    %cst = arith.constant 1.562500e-02 : f32
    %5 = vector.broadcast %cst : f32 to vector<1x128xf32>
    %6 = arith.mulf %4, %5 : vector<1x128xf32>
    %7 = vector.extract_strided_slice %3 {offsets = [1, 0], sizes = [1, 128], strides = [1, 1]} : vector<2x128xf32> to vector<1x128xf32>
    %cst_5 = arith.constant 1.562500e-02 : f32
    %8 = vector.broadcast %cst_5 : f32 to vector<1x128xf32>
    %9 = arith.mulf %7, %8 : vector<1x128xf32>
    %10 = arith.mulf %6, %6 : vector<1x128xf32>
    %11 = arith.subf %9, %10 : vector<1x128xf32>
    %cst_6 = arith.constant 0.000000e+00 : f32
    %12 = vector.broadcast %cst_6 : f32 to vector<1x128xf32>
    %13 = arith.maximumf %11, %12 : vector<1x128xf32>
    %cst_7 = arith.constant 9.99999974E-6 : f32
    %14 = vector.broadcast %cst_7 : f32 to vector<1x128xf32>
    %15 = arith.addf %13, %14 : vector<1x128xf32>
    %16 = math.rsqrt %15 : vector<1x128xf32>
    %17 = vector.broadcast %6 : vector<1x128xf32> to vector<64x128xf32>
    %18 = arith.subf %1, %17 : vector<64x128xf32>
    %19 = vector.broadcast %16 : vector<1x128xf32> to vector<64x128xf32>
    %20 = arith.mulf %18, %19 : vector<64x128xf32>
    %cst_8 = arith.constant 0.000000e+00 : f32
    %21 = vector.broadcast %cst_8 : f32 to vector<64x128xf32>
    %22 = arith.maximumf %20, %21 : vector<64x128xf32>
    %c0_9 = arith.constant 0 : index
    %c0_10 = arith.constant 0 : index
    %c0_11 = arith.constant 0 : index
    %23 = vector.load %arg4[%c0_9, %c0_10, %c0_11] : memref<1x64x128xf32, #tpu.memory_space<vmem>>, vector<1x64x128xf32>
    %24 = vector.shape_cast %23 : vector<1x64x128xf32> to vector<64x128xf32>
    %25 = vector.shape_cast %22 : vector<64x128xf32> to vector<1x64x128xf32>
    tpu.vector_store %arg4[%c0_9, %c0_10, %c0_11], %25 {strides = array<i32>} : memref<1x64x128xf32, #tpu.memory_space<vmem>>, vector<1x64x128xf32>,
    return
  }
  func.func @transform_0(%arg0: i32, %arg1: i32) -> (i32, i32, i32) {
    %c0_i32 = arith.constant 0 : i32
    %c0_i32_0 = arith.constant 0 : i32
    return %arg0, %arg1, %c0_i32 : i32, i32, i32
  }
  func.func @transform_1(%arg0: i32, %arg1: i32) -> (i32, i32, i32) {
    %c0_i32 = arith.constant 0 : i32
    %c0_i32_0 = arith.constant 0 : i32
    %c0_i32_1 = arith.constant 0 : i32
    return %arg0, %c0_i32, %c0_i32_0 : i32, i32, i32
  }
  func.func @transform_2(%arg0: i32, %arg1: i32) -> (i32, i32, i32) {
    %c0_i32 = arith.constant 0 : i32
    %c0_i32_0 = arith.constant 0 : i32
    return %arg0, %arg1, %c0_i32 : i32, i32, i32
  }
}

module attributes {stable_mosaic.version = 11 : i64} {
  func.func @_conv_stats_kernel(%arg0: i32, %arg1: i32, %arg2: memref<1x64x256xbf16, #tpu.memory_space<vmem>>, %arg3: memref<256x128xbf16, #tpu.memory_space<vmem>>, %arg4: memref<1x64x128xf32, #tpu.memory_space<vmem>>, %arg5: memref<1x1x2x128xf32, #tpu.memory_space<vmem>>) attributes {dimension_semantics = [#tpu.dimension_semantics<parallel>, #tpu.dimension_semantics<parallel>], iteration_bounds = array<i64: 2, 1>, scalar_prefetch = 0 : i64, scratch_operands = 0 : i64, tpu.core_type = #tpu.core_type<tc>, window_params = [{transform_indices = @transform_0, window_bounds = array<i64: 1, 64, 256>}, {pipeline_mode = #tpu.pipeline_mode<synchronous>, transform_indices = @transform_1, window_bounds = array<i64: 256, 128>}, {transform_indices = @transform_2, window_bounds = array<i64: 1, 64, 128>}, {transform_indices = @transform_3, window_bounds = array<i64: 1, 1, 2, 128>}]} {
    %c0 = arith.constant 0 : index
    %c0_0 = arith.constant 0 : index
    %c0_1 = arith.constant 0 : index
    %0 = vector.load %arg2[%c0, %c0_0, %c0_1] : memref<1x64x256xbf16, #tpu.memory_space<vmem>>, vector<1x64x256xbf16>
    %1 = vector.shape_cast %0 : vector<1x64x256xbf16> to vector<64x256xbf16>
    %c0_2 = arith.constant 0 : index
    %c0_3 = arith.constant 0 : index
    %2 = vector.load %arg3[%c0_2, %c0_3] : memref<256x128xbf16, #tpu.memory_space<vmem>>, vector<256x128xbf16>
    %cst = arith.constant dense<0.000000e+00> : vector<64x128xf32>
    %3 = tpu.matmul %1, %2, %cst {dimension_numbers = #tpu.dot_dimension_numbers<[1], [0], [0], [1], [0, 0, 1, 1], [], []>} : vector<64x256xbf16>, vector<256x128xbf16>, vector<64x128xf32> -> vector<64x128xf32>
    %c0_4 = arith.constant 0 : index
    %c0_5 = arith.constant 0 : index
    %c0_6 = arith.constant 0 : index
    %4 = vector.load %arg4[%c0_4, %c0_5, %c0_6] : memref<1x64x128xf32, #tpu.memory_space<vmem>>, vector<1x64x128xf32>
    %5 = vector.shape_cast %4 : vector<1x64x128xf32> to vector<64x128xf32>
    %6 = vector.shape_cast %3 : vector<64x128xf32> to vector<1x64x128xf32>
    tpu.vector_store %arg4[%c0_4, %c0_5, %c0_6], %6 {strides = array<i32>} : memref<1x64x128xf32, #tpu.memory_space<vmem>>, vector<1x64x128xf32>,
    %cst_7 = arith.constant dense<0.000000e+00> : vector<128xf32>
    %7 = vector.multi_reduction <add>, %3, %cst_7 [0] : vector<64x128xf32> to vector<128xf32>
    %8 = vector.shape_cast %7 : vector<128xf32> to vector<1x128xf32>
    %9 = arith.mulf %3, %3 : vector<64x128xf32>
    %cst_8 = arith.constant dense<0.000000e+00> : vector<128xf32>
    %10 = vector.multi_reduction <add>, %9, %cst_8 [0] : vector<64x128xf32> to vector<128xf32>
    %11 = vector.shape_cast %10 : vector<128xf32> to vector<1x128xf32>
    %12 = tpu.concatenate %8, %11 in 0 : vector<1x128xf32>, vector<1x128xf32> -> vector<2x128xf32>
    %c0_9 = arith.constant 0 : index
    %c0_10 = arith.constant 0 : index
    %c0_11 = arith.constant 0 : index
    %c0_12 = arith.constant 0 : index
    %13 = vector.load %arg5[%c0_9, %c0_10, %c0_11, %c0_12] : memref<1x1x2x128xf32, #tpu.memory_space<vmem>>, vector<1x1x2x128xf32>
    %14 = vector.shape_cast %13 : vector<1x1x2x128xf32> to vector<2x128xf32>
    %15 = vector.shape_cast %12 : vector<2x128xf32> to vector<1x1x2x128xf32>
    tpu.vector_store %arg5[%c0_9, %c0_10, %c0_11, %c0_12], %15 {strides = array<i32>} : memref<1x1x2x128xf32, #tpu.memory_space<vmem>>, vector<1x1x2x128xf32>,
    return
  }
  func.func @transform_0(%arg0: i32, %arg1: i32) -> (i32, i32, i32) {
    %c0_i32 = arith.constant 0 : i32
    %c0_i32_0 = arith.constant 0 : i32
    return %arg0, %arg1, %c0_i32 : i32, i32, i32
  }
  func.func @transform_1(%arg0: i32, %arg1: i32) -> (i32, i32) {
    %c0_i32 = arith.constant 0 : i32
    %c0_i32_0 = arith.constant 0 : i32
    %c0_i32_1 = arith.constant 0 : i32
    return %c0_i32, %c0_i32_0 : i32, i32
  }
  func.func @transform_2(%arg0: i32, %arg1: i32) -> (i32, i32, i32) {
    %c0_i32 = arith.constant 0 : i32
    %c0_i32_0 = arith.constant 0 : i32
    return %arg0, %arg1, %c0_i32 : i32, i32, i32
  }
  func.func @transform_3(%arg0: i32, %arg1: i32) -> (i32, i32, i32, i32) {
    %c0_i32 = arith.constant 0 : i32
    %c0_i32_0 = arith.constant 0 : i32
    %c0_i32_1 = arith.constant 0 : i32
    return %arg0, %arg1, %c0_i32, %c0_i32_0 : i32, i32, i32, i32
  }
}

module attributes {stable_mosaic.version = 11 : i64} {
  func.func @_conv_stats_kernel(%arg0: i32, %arg1: i32, %arg2: memref<1x16x384xbf16, #tpu.memory_space<vmem>>, %arg3: memref<384x128xbf16, #tpu.memory_space<vmem>>, %arg4: memref<1x16x128xf32, #tpu.memory_space<vmem>>, %arg5: memref<1x1x2x128xf32, #tpu.memory_space<vmem>>) attributes {dimension_semantics = [#tpu.dimension_semantics<parallel>, #tpu.dimension_semantics<parallel>], iteration_bounds = array<i64: 2, 1>, scalar_prefetch = 0 : i64, scratch_operands = 0 : i64, tpu.core_type = #tpu.core_type<tc>, window_params = [{transform_indices = @transform_0, window_bounds = array<i64: 1, 16, 384>}, {pipeline_mode = #tpu.pipeline_mode<synchronous>, transform_indices = @transform_1, window_bounds = array<i64: 384, 128>}, {transform_indices = @transform_2, window_bounds = array<i64: 1, 16, 128>}, {transform_indices = @transform_3, window_bounds = array<i64: 1, 1, 2, 128>}]} {
    %c0 = arith.constant 0 : index
    %c0_0 = arith.constant 0 : index
    %c0_1 = arith.constant 0 : index
    %0 = vector.load %arg2[%c0, %c0_0, %c0_1] : memref<1x16x384xbf16, #tpu.memory_space<vmem>>, vector<1x16x384xbf16>
    %1 = vector.shape_cast %0 : vector<1x16x384xbf16> to vector<16x384xbf16>
    %c0_2 = arith.constant 0 : index
    %c0_3 = arith.constant 0 : index
    %2 = vector.load %arg3[%c0_2, %c0_3] : memref<384x128xbf16, #tpu.memory_space<vmem>>, vector<384x128xbf16>
    %cst = arith.constant dense<0.000000e+00> : vector<16x128xf32>
    %3 = tpu.matmul %1, %2, %cst {dimension_numbers = #tpu.dot_dimension_numbers<[1], [0], [0], [1], [0, 0, 1, 1], [], []>} : vector<16x384xbf16>, vector<384x128xbf16>, vector<16x128xf32> -> vector<16x128xf32>
    %c0_4 = arith.constant 0 : index
    %c0_5 = arith.constant 0 : index
    %c0_6 = arith.constant 0 : index
    %4 = vector.load %arg4[%c0_4, %c0_5, %c0_6] : memref<1x16x128xf32, #tpu.memory_space<vmem>>, vector<1x16x128xf32>
    %5 = vector.shape_cast %4 : vector<1x16x128xf32> to vector<16x128xf32>
    %6 = vector.shape_cast %3 : vector<16x128xf32> to vector<1x16x128xf32>
    tpu.vector_store %arg4[%c0_4, %c0_5, %c0_6], %6 {strides = array<i32>} : memref<1x16x128xf32, #tpu.memory_space<vmem>>, vector<1x16x128xf32>,
    %cst_7 = arith.constant dense<0.000000e+00> : vector<128xf32>
    %7 = vector.multi_reduction <add>, %3, %cst_7 [0] : vector<16x128xf32> to vector<128xf32>
    %8 = vector.shape_cast %7 : vector<128xf32> to vector<1x128xf32>
    %9 = arith.mulf %3, %3 : vector<16x128xf32>
    %cst_8 = arith.constant dense<0.000000e+00> : vector<128xf32>
    %10 = vector.multi_reduction <add>, %9, %cst_8 [0] : vector<16x128xf32> to vector<128xf32>
    %11 = vector.shape_cast %10 : vector<128xf32> to vector<1x128xf32>
    %12 = tpu.concatenate %8, %11 in 0 : vector<1x128xf32>, vector<1x128xf32> -> vector<2x128xf32>
    %c0_9 = arith.constant 0 : index
    %c0_10 = arith.constant 0 : index
    %c0_11 = arith.constant 0 : index
    %c0_12 = arith.constant 0 : index
    %13 = vector.load %arg5[%c0_9, %c0_10, %c0_11, %c0_12] : memref<1x1x2x128xf32, #tpu.memory_space<vmem>>, vector<1x1x2x128xf32>
    %14 = vector.shape_cast %13 : vector<1x1x2x128xf32> to vector<2x128xf32>
    %15 = vector.shape_cast %12 : vector<2x128xf32> to vector<1x1x2x128xf32>
    tpu.vector_store %arg5[%c0_9, %c0_10, %c0_11, %c0_12], %15 {strides = array<i32>} : memref<1x1x2x128xf32, #tpu.memory_space<vmem>>, vector<1x1x2x128xf32>,
    return
  }
  func.func @transform_0(%arg0: i32, %arg1: i32) -> (i32, i32, i32) {
    %c0_i32 = arith.constant 0 : i32
    %c0_i32_0 = arith.constant 0 : i32
    return %arg0, %arg1, %c0_i32 : i32, i32, i32
  }
  func.func @transform_1(%arg0: i32, %arg1: i32) -> (i32, i32) {
    %c0_i32 = arith.constant 0 : i32
    %c0_i32_0 = arith.constant 0 : i32
    %c0_i32_1 = arith.constant 0 : i32
    return %c0_i32, %c0_i32_0 : i32, i32
  }
  func.func @transform_2(%arg0: i32, %arg1: i32) -> (i32, i32, i32) {
    %c0_i32 = arith.constant 0 : i32
    %c0_i32_0 = arith.constant 0 : i32
    return %arg0, %arg1, %c0_i32 : i32, i32, i32
  }
  func.func @transform_3(%arg0: i32, %arg1: i32) -> (i32, i32, i32, i32) {
    %c0_i32 = arith.constant 0 : i32
    %c0_i32_0 = arith.constant 0 : i32
    %c0_i32_1 = arith.constant 0 : i32
    return %arg0, %arg1, %c0_i32, %c0_i32_0 : i32, i32, i32, i32
  }
}

module attributes {stable_mosaic.version = 11 : i64} {
  func.func @kernel(%arg0: i32, %arg1: i32, %arg2: memref<1x16x128xf32, #tpu.memory_space<vmem>>, %arg3: memref<1x2x128xf32, #tpu.memory_space<vmem>>, %arg4: memref<1x16x128xf32, #tpu.memory_space<vmem>>) attributes {dimension_semantics = [#tpu.dimension_semantics<parallel>, #tpu.dimension_semantics<parallel>], iteration_bounds = array<i64: 2, 1>, scalar_prefetch = 0 : i64, scratch_operands = 0 : i64, tpu.core_type = #tpu.core_type<tc>, window_params = [{transform_indices = @transform_0, window_bounds = array<i64: 1, 16, 128>}, {transform_indices = @transform_1, window_bounds = array<i64: 1, 2, 128>}, {transform_indices = @transform_2, window_bounds = array<i64: 1, 16, 128>}]} {
    %c0 = arith.constant 0 : index
    %c0_0 = arith.constant 0 : index
    %c0_1 = arith.constant 0 : index
    %0 = vector.load %arg2[%c0, %c0_0, %c0_1] : memref<1x16x128xf32, #tpu.memory_space<vmem>>, vector<1x16x128xf32>
    %1 = vector.shape_cast %0 : vector<1x16x128xf32> to vector<16x128xf32>
    %c0_2 = arith.constant 0 : index
    %c0_3 = arith.constant 0 : index
    %c0_4 = arith.constant 0 : index
    %2 = vector.load %arg3[%c0_2, %c0_3, %c0_4] : memref<1x2x128xf32, #tpu.memory_space<vmem>>, vector<1x2x128xf32>
    %3 = vector.shape_cast %2 : vector<1x2x128xf32> to vector<2x128xf32>
    %4 = vector.extract_strided_slice %3 {offsets = [0, 0], sizes = [1, 128], strides = [1, 1]} : vector<2x128xf32> to vector<1x128xf32>
    %cst = arith.constant 6.250000e-02 : f32
    %5 = vector.broadcast %cst : f32 to vector<1x128xf32>
    %6 = arith.mulf %4, %5 : vector<1x128xf32>
    %7 = vector.extract_strided_slice %3 {offsets = [1, 0], sizes = [1, 128], strides = [1, 1]} : vector<2x128xf32> to vector<1x128xf32>
    %cst_5 = arith.constant 6.250000e-02 : f32
    %8 = vector.broadcast %cst_5 : f32 to vector<1x128xf32>
    %9 = arith.mulf %7, %8 : vector<1x128xf32>
    %10 = arith.mulf %6, %6 : vector<1x128xf32>
    %11 = arith.subf %9, %10 : vector<1x128xf32>
    %cst_6 = arith.constant 0.000000e+00 : f32
    %12 = vector.broadcast %cst_6 : f32 to vector<1x128xf32>
    %13 = arith.maximumf %11, %12 : vector<1x128xf32>
    %cst_7 = arith.constant 9.99999974E-6 : f32
    %14 = vector.broadcast %cst_7 : f32 to vector<1x128xf32>
    %15 = arith.addf %13, %14 : vector<1x128xf32>
    %16 = math.rsqrt %15 : vector<1x128xf32>
    %17 = vector.broadcast %6 : vector<1x128xf32> to vector<16x128xf32>
    %18 = arith.subf %1, %17 : vector<16x128xf32>
    %19 = vector.broadcast %16 : vector<1x128xf32> to vector<16x128xf32>
    %20 = arith.mulf %18, %19 : vector<16x128xf32>
    %cst_8 = arith.constant 0.000000e+00 : f32
    %21 = vector.broadcast %cst_8 : f32 to vector<16x128xf32>
    %22 = arith.maximumf %20, %21 : vector<16x128xf32>
    %c0_9 = arith.constant 0 : index
    %c0_10 = arith.constant 0 : index
    %c0_11 = arith.constant 0 : index
    %23 = vector.load %arg4[%c0_9, %c0_10, %c0_11] : memref<1x16x128xf32, #tpu.memory_space<vmem>>, vector<1x16x128xf32>
    %24 = vector.shape_cast %23 : vector<1x16x128xf32> to vector<16x128xf32>
    %25 = vector.shape_cast %22 : vector<16x128xf32> to vector<1x16x128xf32>
    tpu.vector_store %arg4[%c0_9, %c0_10, %c0_11], %25 {strides = array<i32>} : memref<1x16x128xf32, #tpu.memory_space<vmem>>, vector<1x16x128xf32>,
    return
  }
  func.func @transform_0(%arg0: i32, %arg1: i32) -> (i32, i32, i32) {
    %c0_i32 = arith.constant 0 : i32
    %c0_i32_0 = arith.constant 0 : i32
    return %arg0, %arg1, %c0_i32 : i32, i32, i32
  }
  func.func @transform_1(%arg0: i32, %arg1: i32) -> (i32, i32, i32) {
    %c0_i32 = arith.constant 0 : i32
    %c0_i32_0 = arith.constant 0 : i32
    %c0_i32_1 = arith.constant 0 : i32
    return %arg0, %c0_i32, %c0_i32_0 : i32, i32, i32
  }
  func.func @transform_2(%arg0: i32, %arg1: i32) -> (i32, i32, i32) {
    %c0_i32 = arith.constant 0 : i32
    %c0_i32_0 = arith.constant 0 : i32
    return %arg0, %arg1, %c0_i32 : i32, i32, i32
  }
}

</mosaic_0001>

<bundles_post_ra>
// kernel: content_encoder_forward.7
= control target key start
LH: loop header
LB: loop body
LE: loop exit
PB: predicated region body
PF: predicated region fallthrough
CT: control target
= control target key end

     0   :  { %s556_s9 = smov 0   ;;  %s558_s10 = smov 0   ;;  %s884_s0 = inlined_call_operand.vmem [shape: f32[2,256,128], index: 0, kind: input, shape index: {}]   ;;  %s885_s1 = inlined_call_operand.vmem [shape: f32[2,2,128], index: 1, kind: input, shape index: {}]   ;;  %s886_s2 = inlined_call_operand.vmem [shape: f32[2,256,128], index: 2, kind: output, shape index: {}]  }
   0x1   :  { %s560_s11 = smov 0  }
   0x2 LB: > { %s24_s12 = sadd.s32 1, %s535_s10  ;;  %p481_p0 = scmp.ge.s32.totalorder %s539_s11, 1  ;;  %s539_s11 = sphi %s560_s11, %s12_s11   ;;  %s535_s10 = sphi %s558_s10, %s888_s10   ;;  %s531_s9 = sphi %s556_s9, %s887_s9  }
   0x3   : > { %p26_p1 = scmp.ge.s32.totalorder %s24_s12, 2  ;;  %p142_p2 = scmp.lt.s32.totalorder %s539_s11, 3 }
   0x5   : > { %s890_s12 = smov (%p26_p1, %s24_s12), 0  ;;  %p143_p3 = pnand %p481_p0, %p142_p2 }
   0x6   : > { %p177_p4 = scmp.lt.s32.totalorder (!%p143_p3), %s531_s9, 1 }
   0x7   : > { %146 = sbr.rel (%p143_p3) target bundleno = 65 (0x41), region = 28 }
   0xc   : > { %s892_s9 = smov (!%p177_p4, %s531_s9), 1  ;;  %v242_v3 = vlaneseq }
   0xd   : > { %s484_s13 = sshll.u32 %s892_s9, 1  ;;  %s489_s17 = sshll.u32 %s892_s9, 8 }
   0xe   : > { %s189_s16 = scalar_lea.vmem %s885_s1, %s484_s13  ;;  %v580_v6 = vshrl.u32 %v242_v3, 7  ;;  %s588_s20 = scalar_lea.vmem %s884_s0, %s489_s17 }
   0xf   : > { %v232_v0 = vld [vmem:[%s189_s16] sm:$0x3]  ;;  %v597_v12 = vld [vmem:[%s588_s20 + $0x8] sm:$0xff]  ;;  %v600_v13 = vld [vmem:[%s588_s20 + $0x10] sm:$0xff]  ;;  %s765_s23 = scalar_lea.vmem %s886_s2, %s489_s17 }
  0x10   : > { %v233_v1 = vmul.f32 0.00390625, %v232_v0  ;;  %v244_v9 = vsub.s32 0, %v580_v6  ;;  %v592_v10 = vld [vmem:[%s588_s20] sm:$0xff]  ;;  %v603_v14 = vld [vmem:[%s588_s20 + $0x18] sm:$0xff]  ;;  %v609_v16 = vld [vmem:[%s588_s20 + $0x28] sm:$0xff]  ;;  %v280_v26 = vsub.s32 1, %v580_v6 }
  0x11   : > { %v606_v15 = vld [vmem:[%s588_s20 + $0x20] sm:$0xff]  ;;  %v612_v17 = vld [vmem:[%s588_s20 + $0x30] sm:$0xff]  ;;  %v615_v18 = vld [vmem:[%s588_s20 + $0x38] sm:$0xff] }
  0x12   : > { %v234_v2 = vmul.f32 %v233_v1, %v233_v1  ;;  %v594_v11 = vrot.slane %v233_v1, %v244_v9  ;;  %v618_v19 = vld [vmem:[%s588_s20 + $0x40] sm:$0xff]  ;;  %v621_v20 = vld [vmem:[%s588_s20 + $0x48] sm:$0xff]  ;;  %v624_v21 = vld [vmem:[%s588_s20 + $0x50] sm:$0xff] }
  0x13   : > { %v627_v22 = vld [vmem:[%s588_s20 + $0x58] sm:$0xff]  ;;  %v630_v23 = vld [vmem:[%s588_s20 + $0x60] sm:$0xff]  ;;  %v633_v24 = vld [vmem:[%s588_s20 + $0x68] sm:$0xff] }
  0x14   : > { %v236_v4 = vrot.slane %v234_v2, 7  ;;  %v246_v25 = vsub.f32 %v592_v10, %v594_v11  ;;  %v639_v27 = vld [vmem:[%s588_s20 + $0x70] sm:$0xff]  ;;  %v642_v28 = vld [vmem:[%s588_s20 + $0x78] sm:$0xff]  ;;  %v645_v29 = vld [vmem:[%s588_s20 + $0x80] sm:$0xff]  ;;  %v247_v30 = vsub.f32 %v597_v12, %v594_v11  ;;  %v248_v31 = vsub.f32 %v600_v13, %v594_v11 }
  0x15   : > { %v249_v32 = vsub.f32 %v603_v14, %v594_v11  ;;  %v250_v33 = vsub.f32 %v606_v15, %v594_v11  ;;  %v656_v34 = vld [vmem:[%s588_s20 + $0x88] sm:$0xff]  ;;  %v659_v35 = vld [vmem:[%s588_s20 + $0x90] sm:$0xff]  ;;  %v662_v36 = vld [vmem:[%s588_s20 + $0x98] sm:$0xff]  ;;  %v251_v37 = vsub.f32 %v609_v16, %v594_v11  ;;  %v252_v38 = vsub.f32 %v612_v17, %v594_v11 }
  0x16   : > { %v238_v5 = vsub.f32 %v233_v1, %v236_v4  ;;  %v253_v39 = vsub.f32 %v615_v18, %v594_v11  ;;  %v254_v40 = vsub.f32 %v618_v19, %v594_v11  ;;  %v673_v41 = vld [vmem:[%s588_s20 + $0xa0] sm:$0xff]  ;;  %v676_v42 = vld [vmem:[%s588_s20 + $0xa8] sm:$0xff]  ;;  %v679_v43 = vld [vmem:[%s588_s20 + $0xb0] sm:$0xff]  ;;  %v255_v44 = vsub.f32 %v621_v20, %v594_v11 }
  0x17   : > { %v256_v45 = vsub.f32 %v624_v21, %v594_v11  ;;  %v257_v46 = vsub.f32 %v627_v22, %v594_v11  ;;  %v258_v47 = vsub.f32 %v630_v23, %v594_v11  ;;  %v690_v48 = vld [vmem:[%s588_s20 + $0xb8] sm:$0xff]  ;;  %v693_v49 = vld [vmem:[%s588_s20 + $0xc0] sm:$0xff]  ;;  %v696_v50 = vld [vmem:[%s588_s20 + $0xc8] sm:$0xff]  ;;  %v259_v51 = vsub.f32 %v633_v24, %v594_v11 }
  0x18   : > { %v239_v7 = vmax.f32 %v238_v5, 0.0  ;;  %v260_v52 = vsub.f32 %v639_v27, %v594_v11  ;;  %v261_v53 = vsub.f32 %v642_v28, %v594_v11  ;;  %v262_v54 = vsub.f32 %v645_v29, %v594_v11  ;;  %v707_v55 = vld [vmem:[%s588_s20 + $0xd0] sm:$0xff]  ;;  %v710_v56 = vld [vmem:[%s588_s20 + $0xd8] sm:$0xff]  ;;  %v713_v57 = vld [vmem:[%s588_s20 + $0xe0] sm:$0xff] }
  0x19   : > { %v263_v58 = vsub.f32 %v656_v34, %v594_v11  ;;  %v264_v59 = vsub.f32 %v659_v35, %v594_v11  ;;  %v265_v60 = vsub.f32 %v662_v36, %v594_v11  ;;  %v266_v61 = vsub.f32 %v673_v41, %v594_v11  ;;  %v724_v62 = vld [vmem:[%s588_s20 + $0xe8] sm:$0xff]  ;;  %v727_v63 = vld [vmem:[%s588_s20 + $0xf0] sm:$0xff]  ;;  %v730_v0 = vld [vmem:[%s588_s20 + $0xf8] sm:$0xff] }
  0x1a   : > { %v240_v8 = vadd.f32 1e-05, %v239_v7  ;;  %v267_v2 = vsub.f32 %v676_v42, %v594_v11  ;;  %v268_v3 = vsub.f32 %v679_v43, %v594_v11  ;;  %v269_v4 = vsub.f32 %v690_v48, %v594_v11 }
  0x1b   : > { %v270_v5 = vsub.f32 %v693_v49, %v594_v11  ;;  %v271_v7 = vsub.f32 %v696_v50, %v594_v11  ;;  %v273_v9 = vsub.f32 %v710_v56, %v594_v11  ;;  %v274_v10 = vsub.f32 %v713_v57, %v594_v11 }
  0x1c   : > { %515 = vrsqrt.f32 %v240_v8  ;;  %v272_v8 = vsub.f32 %v707_v55, %v594_v11  ;;  %v275_v12 = vsub.f32 %v724_v62, %v594_v11  ;;  %v276_v13 = vsub.f32 %v727_v63, %v594_v11 }
  0x1d   : > { %v277_v14 = vsub.f32 %v730_v0, %v594_v11 }
  0x29   : > { %v516_v1 = vpop.eup %515 }
  0x2a   : > { %v740_v6 = vrot.slane %v516_v1, %v280_v26 }
  0x2c   : > { %v282_v15 = vmul.f32 %v740_v6, %v246_v25  ;;  %v283_v16 = vmul.f32 %v740_v6, %v247_v30  ;;  %v284_v17 = vmul.f32 %v740_v6, %v248_v31  ;;  %v285_v18 = vmul.f32 %v740_v6, %v249_v32 }
  0x2d   : > { %v286_v19 = vmul.f32 %v740_v6, %v250_v33  ;;  %v287_v20 = vmul.f32 %v740_v6, %v251_v37  ;;  %v288_v21 = vmul.f32 %v740_v6, %v252_v38  ;;  %v289_v22 = vmul.f32 %v740_v6, %v253_v39 }
  0x2e   : > { %v314_v23 = vmax.f32 %v282_v15, 0.0  ;;  %v315_v24 = vmax.f32 %v283_v16, 0.0  ;;  %v316_v25 = vmax.f32 %v284_v17, 0.0  ;;  %v317_v26 = vmax.f32 %v285_v18, 0.0 }
  0x2f   : > { %v318_v27 = vmax.f32 %v286_v19, 0.0  ;;  %v319_v28 = vmax.f32 %v287_v20, 0.0  ;;  %v320_v30 = vmax.f32 %v288_v21, 0.0  ;;  %v321_v31 = vmax.f32 %v289_v22, 0.0 }
  0x30   : > { %346 = vst [vmem:[%s765_s23] sm:$0xff] %v314_v23  ;;  %347 = vst [vmem:[%s765_s23 + $0x8] sm:$0xff] %v315_v24  ;;  %v290_v32 = vmul.f32 %v740_v6, %v254_v40  ;;  %v291_v33 = vmul.f32 %v740_v6, %v255_v44  ;;  %v292_v37 = vmul.f32 %v740_v6, %v256_v45 }
  0x31   : > { %348 = vst [vmem:[%s765_s23 + $0x10] sm:$0xff] %v316_v25  ;;  %349 = vst [vmem:[%s765_s23 + $0x18] sm:$0xff] %v317_v26  ;;  %v293_v38 = vmul.f32 %v740_v6, %v257_v46  ;;  %v294_v39 = vmul.f32 %v740_v6, %v258_v47  ;;  %v295_v1 = vmul.f32 %v740_v6, %v259_v51 }
  0x32   : > { %350 = vst [vmem:[%s765_s23 + $0x20] sm:$0xff] %v318_v27  ;;  %351 = vst [vmem:[%s765_s23 + $0x28] sm:$0xff] %v319_v28  ;;  %v296_v40 = vmul.f32 %v740_v6, %v260_v52  ;;  %v297_v44 = vmul.f32 %v740_v6, %v261_v53  ;;  %v322_v15 = vmax.f32 %v290_v32, 0.0  ;;  %v323_v45 = vmax.f32 %v291_v33, 0.0 }
  0x33   : > { %352 = vst [vmem:[%s765_s23 + $0x30] sm:$0xff] %v320_v30  ;;  %353 = vst [vmem:[%s765_s23 + $0x38] sm:$0xff] %v321_v31  ;;  %v324_v46 = vmax.f32 %v292_v37, 0.0  ;;  %v325_v16 = vmax.f32 %v293_v38, 0.0  ;;  %v326_v17 = vmax.f32 %v294_v39, 0.0  ;;  %v327_v18 = vmax.f32 %v295_v1, 0.0 }
  0x34   : > { %v328_v19 = vmax.f32 %v296_v40, 0.0  ;;  %v329_v20 = vmax.f32 %v297_v44, 0.0  ;;  %354 = vst [vmem:[%s765_s23 + $0x40] sm:$0xff] %v322_v15  ;;  %355 = vst [vmem:[%s765_s23 + $0x48] sm:$0xff] %v323_v45  ;;  %v298_v47 = vmul.f32 %v740_v6, %v262_v54  ;;  %v299_v51 = vmul.f32 %v740_v6, %v263_v58 }
  0x35   : > { %356 = vst [vmem:[%s765_s23 + $0x50] sm:$0xff] %v324_v46  ;;  %357 = vst [vmem:[%s765_s23 + $0x58] sm:$0xff] %v325_v16  ;;  %v300_v52 = vmul.f32 %v740_v6, %v264_v59  ;;  %v301_v53 = vmul.f32 %v740_v6, %v265_v60  ;;  %v302_v29 = vmul.f32 %v740_v6, %v266_v61 }
  0x36   : > { %358 = vst [vmem:[%s765_s23 + $0x60] sm:$0xff] %v326_v17  ;;  %359 = vst [vmem:[%s765_s23 + $0x68] sm:$0xff] %v327_v18  ;;  %v303_v34 = vmul.f32 %v740_v6, %v267_v2  ;;  %v304_v35 = vmul.f32 %v740_v6, %v268_v3  ;;  %v305_v36 = vmul.f32 %v740_v6, %v269_v4  ;;  %v330_v54 = vmax.f32 %v298_v47, 0.0 }
  0x37   : > { %360 = vst [vmem:[%s765_s23 + $0x70] sm:$0xff] %v328_v19  ;;  %361 = vst [vmem:[%s765_s23 + $0x78] sm:$0xff] %v329_v20  ;;  %v331_v41 = vmax.f32 %v299_v51, 0.0  ;;  %v332_v58 = vmax.f32 %v300_v52, 0.0  ;;  %v333_v59 = vmax.f32 %v301_v53, 0.0  ;;  %v334_v42 = vmax.f32 %v302_v29, 0.0 }
  0x38   : > { %v335_v60 = vmax.f32 %v303_v34, 0.0  ;;  %v336_v61 = vmax.f32 %v304_v35, 0.0  ;;  %v337_v2 = vmax.f32 %v305_v36, 0.0  ;;  %362 = vst [vmem:[%s765_s23 + $0x80] sm:$0xff] %v330_v54  ;;  %v306_v43 = vmul.f32 %v740_v6, %v270_v5 }
  0x39   : > { %363 = vst [vmem:[%s765_s23 + $0x88] sm:$0xff] %v331_v41  ;;  %364 = vst [vmem:[%s765_s23 + $0x90] sm:$0xff] %v332_v58  ;;  %v307_v48 = vmul.f32 %v740_v6, %v271_v7  ;;  %v308_v3 = vmul.f32 %v740_v6, %v272_v8  ;;  %v309_v4 = vmul.f32 %v740_v6, %v273_v9 }
  0x3a   : > { %365 = vst [vmem:[%s765_s23 + $0x98] sm:$0xff] %v333_v59  ;;  %366 = vst [vmem:[%s765_s23 + $0xa0] sm:$0xff] %v334_v42  ;;  %v310_v49 = vmul.f32 %v740_v6, %v274_v10  ;;  %v311_v50 = vmul.f32 %v740_v6, %v275_v12  ;;  %v312_v55 = vmul.f32 %v740_v6, %v276_v13  ;;  %v338_v57 = vmax.f32 %v306_v43, 0.0 }
  0x3b   : > { %367 = vst [vmem:[%s765_s23 + $0xa8] sm:$0xff] %v335_v60  ;;  %368 = vst [vmem:[%s765_s23 + $0xb0] sm:$0xff] %v336_v61  ;;  %v313_v56 = vmul.f32 %v740_v6, %v277_v14  ;;  %v339_v5 = vmax.f32 %v307_v48, 0.0  ;;  %v340_v7 = vmax.f32 %v308_v3, 0.0  ;;  %v341_v62 = vmax.f32 %v309_v4, 0.0 }
  0x3c   : > { %369 = vst [vmem:[%s765_s23 + $0xb8] sm:$0xff] %v337_v2  ;;  %v342_v8 = vmax.f32 %v310_v49, 0.0  ;;  %v343_v9 = vmax.f32 %v311_v50, 0.0  ;;  %v344_v10 = vmax.f32 %v312_v55, 0.0  ;;  %370 = vst [vmem:[%s765_s23 + $0xc0] sm:$0xff] %v338_v57 }
  0x3d   : > { %v345_v12 = vmax.f32 %v313_v56, 0.0  ;;  %371 = vst [vmem:[%s765_s23 + $0xc8] sm:$0xff] %v339_v5  ;;  %372 = vst [vmem:[%s765_s23 + $0xd0] sm:$0xff] %v340_v7 }
  0x3e   : > { %373 = vst [vmem:[%s765_s23 + $0xd8] sm:$0xff] %v341_v62  ;;  %374 = vst [vmem:[%s765_s23 + $0xe0] sm:$0xff] %v342_v8 }
  0x3f   : > { %375 = vst [vmem:[%s765_s23 + $0xe8] sm:$0xff] %v343_v9  ;;  %376 = vst [vmem:[%s765_s23 + $0xf0] sm:$0xff] %v344_v10 }
  0x40   : > { %377 = vst [vmem:[%s765_s23 + $0xf8] sm:$0xff] %v345_v12 }
  0x41 PF: > { %s12_s11 = sadd.s32 1, %s539_s11   ;;  %s887_s9 = smov %s535_s10 }
  0x42   : > { %p9_p5 = scmp.ge.s32.totalorder %s12_s11, 4   ;;  %s888_s10 = smov %s890_s12 }
  0x44   :  { %11 = sbr.rel (!%p9_p5) target bundleno = 2 (0x2), region = 61 }

// kernel: content_encoder_forward.6
= control target key start
LH: loop header
LB: loop body
LE: loop exit
PB: predicated region body
PF: predicated region fallthrough
CT: control target
= control target key end

     0   :  { %s1308_s12 = smov 0   ;;  %s1310_s13 = smov 0   ;;  %s1558_s0 = inlined_call_operand.vmem [shape: bf16[2,256,256], index: 0, kind: input, shape index: {}]   ;;  %s1559_s1 = inlined_call_operand.vmem [shape: bf16[256,128], index: 1, kind: input, shape index: {}]   ;;  %s1560_s2 = inlined_call_operand.vmem [shape: f32[2,256,128], index: 2, kind: output, shape index: {0}]   ;;  %s1561_s3 = inlined_call_operand.vmem [shape: f32[2,1,2,128], index: 3, kind: output, shape index: {1}]  }
   0x1   :  { %s1312_s14 = smov 0  }
   0x2 LB: > { %s26_s15 = sadd.s32 1, %s1282_s13  ;;  %p990_p0 = scmp.ge.s32.totalorder %s1286_s14, 1  ;;  %s1286_s14 = sphi %s1312_s14, %s14_s14   ;;  %s1282_s13 = sphi %s1310_s13, %s1563_s13   ;;  %s1278_s12 = sphi %s1308_s12, %s1562_s12  }
   0x3   : > { %p28_p1 = scmp.ge.s32.totalorder %s26_s15, 2  ;;  %p164_p2 = scmp.lt.s32.totalorder %s1286_s14, 3 }
   0x5   : > { %s1565_s15 = smov (%p28_p1, %s26_s15), 0  ;;  %p165_p3 = pnand %p990_p0, %p164_p2 }
   0x6   : > { %p205_p4 = scmp.lt.s32.totalorder (!%p165_p3), %s1278_s12, 1 }
   0x7   : > { %168 = sbr.rel (%p165_p3) target bundleno = 352 (0x160), region = 28 }
   0xc   : > { %v1200_v0 = vld [vmem:[%s1559_s1 + $0x78] sm:$0xff]   ;;  %v1202_v2 = vld [vmem:[%s1559_s1 + $0x70] sm:$0xff]   ;;  %v1204_v4 = vld [vmem:[%s1559_s1 + $0x68] sm:$0xff]   ;;  %s1567_s12 = smov (!%p205_p4, %s1278_s12), 1  ;;  %vm852_vm0 = vcmask 1040384  }
   0xd   : > { %v1201_v1 = vld [vmem:[%s1559_s1 + $0x38] sm:$0xff]   ;;  %1048 = vmatprep.subr.bf16.mxu0 %v1200_v0  ;;  %1160 = vmatprep.subr.bf16.mxu1 %v1200_v0  ;;  %v1203_v3 = vld [vmem:[%s1559_s1 + $0x30] sm:$0xff]   ;;  %v1205_v5 = vld [vmem:[%s1559_s1 + $0x28] sm:$0xff]   ;;  %s1046_s5 = sshll.u32 %s1567_s12, 8 }
   0xe   : > { %1049 = vmatpush3.bf16.msra.mxu0 %v1201_v1  ;;  %1168 = vmatpush3.bf16.msra.mxu1 %v1201_v1  ;;  %v1206_v6 = vld [vmem:[%s1559_s1 + $0x60] sm:$0xff]   ;;  %v1208_v8 = vld [vmem:[%s1559_s1 + $0x58] sm:$0xff]   ;;  %s1361_s10 = scalar_lea.vmem %s1558_s0, %s1046_s5  ;;  %v1210_v10 = vld [vmem:[%s1559_s1 + $0x50] sm:$0xff]   ;;  %s1421_s4 = scalar_lea.vmem %s1560_s2, %s1046_s5 }
   0xf   : > { %1050 = vmatprep.subr.bf16.mxu0 %v1202_v2  ;;  %1161 = vmatprep.subr.bf16.mxu1 %v1202_v2  ;;  %v1207_v7 = vld [vmem:[%s1559_s1 + $0x20] sm:$0xff]   ;;  %v1209_v9 = vld [vmem:[%s1559_s1 + $0x18] sm:$0xff]   ;;  %v1211_v12 = vld [vmem:[%s1559_s1 + $0x10] sm:$0xff]   ;;  %s995_s5 = sshll.u32 %s1567_s12, 1 }
  0x10   : > { %v1218_v11 = vld [vmem:[%s1361_s10 + $0x4] ss:$8 sps:$4 sm:$0xff]   ;;  %v1216_v18 = vld [vmem:[%s1361_s10] ss:$8 sps:$4 sm:$0xff]   ;;  %v1219_v19 = vld [vmem:[%s1361_s10 + $0x14] ss:$8 sps:$4 sm:$0xff]   ;;  %s231_s8 = scalar_lea.vmem %s1561_s3, %s995_s5 }
  0x11   : > { %585 = vmatprep.mubr.bf16.mxu0 %v1218_v11  ;;  %v1212_v13 = vld [vmem:[%s1559_s1 + $0x48] sm:$0xff]   ;;  %v1214_v16 = vld [vmem:[%s1559_s1 + $0x40] sm:$0xff]   ;;  %v1234_v21 = vld [vmem:[%s1361_s10 + $0x94] ss:$8 sps:$4 sm:$0xff]  }
  0x12   : > { %1051 = vmatpush3.bf16.msra.mxu0 %v1203_v3  ;;  %1169 = vmatpush3.bf16.msra.mxu1 %v1203_v3  ;;  %v1230_v14 = vld [vmem:[%s1361_s10 + $0x84] ss:$8 sps:$4 sm:$0xff]   ;;  %v1228_v20 = vld [vmem:[%s1361_s10 + $0x80] ss:$8 sps:$4 sm:$0xff]   ;;  %v1221_v22 = vld [vmem:[%s1361_s10 + $0x10] ss:$8 sps:$4 sm:$0xff]  }
  0x13   : > { %1052 = vmatprep.subr.bf16.mxu0 %v1204_v4  ;;  %1162 = vmatprep.subr.bf16.mxu1 %v1204_v4  ;;  %v1213_v15 = vld [vmem:[%s1559_s1 + $0x8] sm:$0xff]   ;;  %v1215_v17 = vld [vmem:[%s1559_s1] sm:$0xff]   ;;  %v1236_v24 = vld [vmem:[%s1361_s10 + $0x90] ss:$8 sps:$4 sm:$0xff]  }
  0x14   : > { %649 = vmatprep.mubr.bf16.mxu1 %v1230_v14  ;;  %v1222_v23 = vld [vmem:[%s1361_s10 + $0x24] ss:$8 sps:$4 sm:$0xff]   ;;  %v1224_v26 = vld [vmem:[%s1361_s10 + $0x20] ss:$8 sps:$4 sm:$0xff]   ;;  %v1225_v27 = vld [vmem:[%s1361_s10 + $0x34] ss:$8 sps:$4 sm:$0xff]  }
  0x15   : > { %v1240_v25 = vld [vmem:[%s1361_s10 + $0xa4] ss:$8 sps:$4 sm:$0xff]   ;;  %v1242_v28 = vld [vmem:[%s1361_s10 + $0xa0] ss:$8 sps:$4 sm:$0xff]   ;;  %v1246_v29 = vld [vmem:[%s1361_s10 + $0xb4] ss:$8 sps:$4 sm:$0xff]  }
  0x16   : > { %1053 = vmatpush3.bf16.msra.mxu0 %v1205_v5  ;;  %1170 = vmatpush3.bf16.msra.mxu1 %v1205_v5  ;;  %v1227_v30 = vld [vmem:[%s1361_s10 + $0x30] ss:$8 sps:$4 sm:$0xff]   ;;  %v1231_v31 = vld [vmem:[%s1361_s10 + $0x44] ss:$8 sps:$4 sm:$0xff]   ;;  %v1233_v34 = vld [vmem:[%s1361_s10 + $0x40] ss:$8 sps:$4 sm:$0xff]  }
  0x17   : > { %1054 = vmatprep.subr.bf16.mxu0 %v1206_v6  ;;  %1163 = vmatprep.subr.bf16.mxu1 %v1206_v6  ;;  %v1248_v32 = vld [vmem:[%s1361_s10 + $0xb0] ss:$8 sps:$4 sm:$0xff]   ;;  %v1252_v33 = vld [vmem:[%s1361_s10 + $0xc4] ss:$8 sps:$4 sm:$0xff]   ;;  %v1237_v35 = vld [vmem:[%s1361_s10 + $0x54] ss:$8 sps:$4 sm:$0xff]  }
  0x18   : > { %v1254_v36 = vld [vmem:[%s1361_s10 + $0xc0] ss:$8 sps:$4 sm:$0xff]   ;;  %v1255_v37 = vld [vmem:[%s1361_s10 + $0xd4] ss:$8 sps:$4 sm:$0xff]   ;;  %v1239_v38 = vld [vmem:[%s1361_s10 + $0x50] ss:$8 sps:$4 sm:$0xff]  }
  0x19   : > { %v1243_v39 = vld [vmem:[%s1361_s10 + $0x64] ss:$8 sps:$4 sm:$0xff]   ;;  %v1257_v40 = vld [vmem:[%s1361_s10 + $0xd0] ss:$8 sps:$4 sm:$0xff]   ;;  %v1245_v42 = vld [vmem:[%s1361_s10 + $0x60] ss:$8 sps:$4 sm:$0xff]  }
  0x1a   : > { %1055 = vmatpush3.bf16.msra.mxu0 %v1207_v7  ;;  %1171 = vmatpush3.bf16.msra.mxu1 %v1207_v7  ;;  %v1258_v41 = vld [vmem:[%s1361_s10 + $0xe4] ss:$8 sps:$4 sm:$0xff]   ;;  %v1249_v43 = vld [vmem:[%s1361_s10 + $0x74] ss:$8 sps:$4 sm:$0xff]   ;;  %v1260_v44 = vld [vmem:[%s1361_s10 + $0xe0] ss:$8 sps:$4 sm:$0xff]  }
  0x1b   : > { %1056 = vmatprep.subr.bf16.mxu0 %v1208_v8  ;;  %1164 = vmatprep.subr.bf16.mxu1 %v1208_v8  ;;  %v1261_v45 = vld [vmem:[%s1361_s10 + $0xf4] ss:$8 sps:$4 sm:$0xff]   ;;  %v1251_v46 = vld [vmem:[%s1361_s10 + $0x70] ss:$8 sps:$4 sm:$0xff]  }
  0x1c   : > { %v1263_v47 = vld [vmem:[%s1361_s10 + $0xf0] ss:$8 sps:$4 sm:$0xff]  }
  0x1e   : > { %1057 = vmatpush3.bf16.msra.mxu0 %v1209_v9  ;;  %1172 = vmatpush3.bf16.msra.mxu1 %v1209_v9 }
  0x1f   : > { %1058 = vmatprep.subr.bf16.mxu0 %v1210_v10  ;;  %1165 = vmatprep.subr.bf16.mxu1 %v1210_v10 }
  0x22   : > { %1059 = vmatpush3.bf16.msra.mxu0 %v1211_v12  ;;  %1173 = vmatpush3.bf16.msra.mxu1 %v1211_v12 }
  0x23   : > { %1060 = vmatprep.subr.bf16.mxu0 %v1212_v13  ;;  %1166 = vmatprep.subr.bf16.mxu1 %v1212_v13 }
  0x26   : > { %1061 = vmatpush3.bf16.msra.mxu0 %v1213_v15  ;;  %1174 = vmatpush3.bf16.msra.mxu1 %v1213_v15 }
  0x27   : > { %1062 = vmatprep.subr.bf16.mxu0 %v1214_v16  ;;  %1167 = vmatprep.subr.bf16.mxu1 %v1214_v16 }
  0x2a   : > { %1063 = vmatpush3.bf16.msra.mxu0 %v1215_v17  ;;  %1175 = vmatpush3.bf16.msra.mxu1 %v1215_v17 }
  0x2d   : > { %586 = vmatmul.mubr.bf16.vlgmr.msra.gmra.mxu0 %v1216_v18  ;;  %650 = vmatmul.mubr.bf16.vlgmr.msra.gmra.mxu1 %v1228_v20 }
  0x2e   : > { %593 = vmatprep.mubr.bf16.mxu0 %v1219_v19  ;;  %657 = vmatprep.mubr.bf16.mxu1 %v1234_v21 }
  0x35   : > { %594 = vmatmul.mubr.bf16.gmra.mxu0 %v1221_v22  ;;  %658 = vmatmul.mubr.bf16.gmra.mxu1 %v1236_v24 }
  0x36   : > { %601 = vmatprep.mubr.bf16.mxu0 %v1222_v23  ;;  %665 = vmatprep.mubr.bf16.mxu1 %v1240_v25 }
  0x3d   : > { %602 = vmatmul.mubr.bf16.gmra.mxu0 %v1224_v26  ;;  %666 = vmatmul.mubr.bf16.gmra.mxu1 %v1242_v28 }
  0x3e   : > { %609 = vmatprep.mubr.bf16.mxu0 %v1225_v27  ;;  %673 = vmatprep.mubr.bf16.mxu1 %v1246_v29 }
  0x45   : > { %610 = vmatmul.mubr.bf16.gmra.mxu0 %v1227_v30  ;;  %674 = vmatmul.mubr.bf16.gmra.mxu1 %v1248_v32 }
  0x46   : > { %617 = vmatprep.mubr.bf16.mxu0 %v1231_v31  ;;  %681 = vmatprep.mubr.bf16.mxu1 %v1252_v33 }
  0x4d   : > { %618 = vmatmul.mubr.bf16.gmra.mxu0 %v1233_v34  ;;  %682 = vmatmul.mubr.bf16.gmra.mxu1 %v1254_v36 }
  0x4e   : > { %625 = vmatprep.mubr.bf16.mxu0 %v1237_v35  ;;  %689 = vmatprep.mubr.bf16.mxu1 %v1255_v37 }
  0x55   : > { %626 = vmatmul.mubr.bf16.gmra.mxu0 %v1239_v38  ;;  %690 = vmatmul.mubr.bf16.gmra.mxu1 %v1257_v40 }
  0x56   : > { %633 = vmatprep.mubr.bf16.mxu0 %v1243_v39  ;;  %697 = vmatprep.mubr.bf16.mxu1 %v1258_v41 }
  0x5d   : > { %634 = vmatmul.mubr.bf16.gmra.mxu0 %v1245_v42  ;;  %698 = vmatmul.mubr.bf16.gmra.mxu1 %v1260_v44 }
  0x5e   : > { %641 = vmatprep.mubr.bf16.mxu0 %v1249_v43  ;;  %705 = vmatprep.mubr.bf16.mxu1 %v1261_v45 }
  0x65   : > { %642 = vmatmul.mubr.bf16.gmra.mxu0 %v1251_v46  ;;  %706 = vmatmul.mubr.bf16.gmra.mxu1 %v1263_v47 }
  0xed   : > { %v1064_v48 = vpop.f32.mrf.mxu0  ;;  %v1112_v49 = vpop.f32.mrf.mxu1 }
  0xef   : > { %v1065_v50 = vpop.f32.mrf.mxu0  ;;  %v1113_v52 = vpop.f32.mrf.mxu1 }
  0xf0   : > { %v1423_v51 = vadd.f32 %v1065_v50, %v1064_v48  ;;  %v1425_v54 = vadd.f32 %v1113_v52, %v1112_v49 }
  0xf1   : > { %v1067_v53 = vpop.f32.mrf.mxu0  ;;  %v1115_v55 = vpop.f32.mrf.mxu1 }
  0xf2   : > { %714 = vst [vmem:[%s1421_s4] sm:$0xff] %v1423_v51  ;;  %730 = vst [vmem:[%s1421_s4 + $0x80] sm:$0xff] %v1425_v54  ;;  %v783_v40 = vmul.f32 %v1423_v51, %v1423_v51 }
  0xf3   : > { %v1068_v56 = vpop.f32.mrf.mxu0  ;;  %v1116_v58 = vpop.f32.mrf.mxu1 }
  0xf4   : > { %v1069_v57 = vadd.f32 %v1068_v56, %v1067_v53  ;;  %v1431_v60 = vadd.f32 %v1116_v58, %v1115_v55 }
  0xf5   : > { %v1070_v59 = vpop.f32.mrf.mxu0  ;;  %v1118_v61 = vpop.f32.mrf.mxu1 }
  0xf6   : > { %715 = vst [vmem:[%s1421_s4 + $0x8] sm:$0xff] %v1069_v57  ;;  %731 = vst [vmem:[%s1421_s4 + $0x88] sm:$0xff] %v1431_v60  ;;  %v784_v35 = vmul.f32 %v1069_v57, %v1069_v57  ;;  %v746_v41 = vadd.f32 %v1069_v57, %v1423_v51 }
  0xf7   : > { %v1071_v62 = vpop.f32.mrf.mxu0  ;;  %v1119_v0 = vpop.f32.mrf.mxu1 }
  0xf8   : > { %v1072_v63 = vadd.f32 %v1071_v62, %v1070_v59  ;;  %v1436_v2 = vadd.f32 %v1119_v0, %v1118_v61  ;;  %v815_v45 = vadd.f32 %v784_v35, %v783_v40 }
  0xf9   : > { %v1073_v1 = vpop.f32.mrf.mxu0  ;;  %v1121_v3 = vpop.f32.mrf.mxu1 }
  0xfa   : > { %716 = vst [vmem:[%s1421_s4 + $0x10] sm:$0xff] %v1072_v63  ;;  %732 = vst [vmem:[%s1421_s4 + $0x90] sm:$0xff] %v1436_v2  ;;  %v785_v42 = vmul.f32 %v1072_v63, %v1072_v63  ;;  %v747_v46 = vadd.f32 %v1072_v63, %v746_v41 }
  0xfb   : > { %v1074_v4 = vpop.f32.mrf.mxu0  ;;  %v1122_v6 = vpop.f32.mrf.mxu1 }
  0xfc   : > { %v1075_v5 = vadd.f32 %v1074_v4, %v1073_v1  ;;  %v1441_v8 = vadd.f32 %v1122_v6, %v1121_v3  ;;  %v816_v53 = vadd.f32 %v815_v45, %v785_v42 }
  0xfd   : > { %v1076_v7 = vpop.f32.mrf.mxu0  ;;  %v1124_v9 = vpop.f32.mrf.mxu1 }
  0xfe   : > { %717 = vst [vmem:[%s1421_s4 + $0x18] sm:$0xff] %v1075_v5  ;;  %733 = vst [vmem:[%s1421_s4 + $0x98] sm:$0xff] %v1441_v8  ;;  %v786_v47 = vmul.f32 %v1075_v5, %v1075_v5  ;;  %v748_v55 = vadd.f32 %v1075_v5, %v747_v46 }
  0xff   : > { %v1077_v10 = vpop.f32.mrf.mxu0  ;;  %v1125_v12 = vpop.f32.mrf.mxu1 }
 0x100   : > { %v1078_v11 = vadd.f32 %v1077_v10, %v1076_v7  ;;  %v1446_v14 = vadd.f32 %v1125_v12, %v1124_v9  ;;  %v817_v58 = vadd.f32 %v816_v53, %v786_v47 }
 0x101   : > { %v1079_v13 = vpop.f32.mrf.mxu0  ;;  %v1127_v15 = vpop.f32.mrf.mxu1 }
 0x102   : > { %718 = vst [vmem:[%s1421_s4 + $0x20] sm:$0xff] %v1078_v11  ;;  %734 = vst [vmem:[%s1421_s4 + $0xa0] sm:$0xff] %v1446_v14  ;;  %v787_v51 = vmul.f32 %v1078_v11, %v1078_v11  ;;  %v749_v59 = vadd.f32 %v1078_v11, %v748_v55 }
 0x103   : > { %v1080_v16 = vpop.f32.mrf.mxu0  ;;  %v1128_v18 = vpop.f32.mrf.mxu1 }
 0x104   : > { %v1081_v17 = vadd.f32 %v1080_v16, %v1079_v13  ;;  %v1451_v20 = vadd.f32 %v1128_v18, %v1127_v15  ;;  %v818_v3 = vadd.f32 %v817_v58, %v787_v51 }
 0x105   : > { %v1082_v19 = vpop.f32.mrf.mxu0  ;;  %v1130_v21 = vpop.f32.mrf.mxu1 }
 0x106   : > { %719 = vst [vmem:[%s1421_s4 + $0x28] sm:$0xff] %v1081_v17  ;;  %735 = vst [vmem:[%s1421_s4 + $0xa8] sm:$0xff] %v1451_v20  ;;  %v788_v61 = vmul.f32 %v1081_v17, %v1081_v17  ;;  %v750_v4 = vadd.f32 %v1081_v17, %v749_v59 }
 0x107   : > { %v1083_v22 = vpop.f32.mrf.mxu0  ;;  %v1131_v24 = vpop.f32.mrf.mxu1 }
 0x108   : > { %v1084_v23 = vadd.f32 %v1083_v22, %v1082_v19  ;;  %v1456_v26 = vadd.f32 %v1131_v24, %v1130_v21  ;;  %v819_v9 = vadd.f32 %v818_v3, %v788_v61 }
 0x109   : > { %v1085_v25 = vpop.f32.mrf.mxu0  ;;  %v1133_v27 = vpop.f32.mrf.mxu1 }
 0x10a   : > { %720 = vst [vmem:[%s1421_s4 + $0x30] sm:$0xff] %v1084_v23  ;;  %736 = vst [vmem:[%s1421_s4 + $0xb0] sm:$0xff] %v1456_v26  ;;  %v789_v5 = vmul.f32 %v1084_v23, %v1084_v23  ;;  %v751_v10 = vadd.f32 %v1084_v23, %v750_v4 }
 0x10b   : > { %v1086_v28 = vpop.f32.mrf.mxu0  ;;  %v1134_v30 = vpop.f32.mrf.mxu1 }
 0x10c   : > { %v1087_v29 = vadd.f32 %v1086_v28, %v1085_v25  ;;  %v1461_v32 = vadd.f32 %v1134_v30, %v1133_v27  ;;  %v820_v18 = vadd.f32 %v819_v9, %v789_v5 }
 0x10d   : > { %v1088_v31 = vpop.f32.mrf.mxu0  ;;  %v1136_v33 = vpop.f32.mrf.mxu1 }
 0x10e   : > { %721 = vst [vmem:[%s1421_s4 + $0x38] sm:$0xff] %v1087_v29  ;;  %737 = vst [vmem:[%s1421_s4 + $0xb8] sm:$0xff] %v1461_v32  ;;  %v790_v12 = vmul.f32 %v1087_v29, %v1087_v29  ;;  %v752_v19 = vadd.f32 %v1087_v29, %v751_v10 }
 0x10f   : > { %v1089_v34 = vpop.f32.mrf.mxu0  ;;  %v1137_v37 = vpop.f32.mrf.mxu1 }
 0x110   : > { %v1090_v36 = vadd.f32 %v1089_v34, %v1088_v31  ;;  %v1466_v39 = vadd.f32 %v1137_v37, %v1136_v33  ;;  %v821_v24 = vadd.f32 %v820_v18, %v790_v12  ;;  %v800_v18 = vmul.f32 %v1431_v60, %v1431_v60 }
 0x111   : > { %v1091_v38 = vpop.f32.mrf.mxu0  ;;  %v1139_v43 = vpop.f32.mrf.mxu1 }
 0x112   : > { %722 = vst [vmem:[%s1421_s4 + $0x40] sm:$0xff] %v1090_v36  ;;  %738 = vst [vmem:[%s1421_s4 + $0xc0] sm:$0xff] %v1466_v39  ;;  %v791_v17 = vmul.f32 %v1090_v36, %v1090_v36  ;;  %v753_v25 = vadd.f32 %v1090_v36, %v752_v19 }
 0x113   : > { %v1092_v44 = vpop.f32.mrf.mxu0  ;;  %v1140_v49 = vpop.f32.mrf.mxu1 }
 0x114   : > { %v1093_v48 = vadd.f32 %v1092_v44, %v1091_v38  ;;  %v1474_v52 = vadd.f32 %v1140_v49, %v1139_v43  ;;  %v822_v33 = vadd.f32 %v821_v24, %v791_v17 }
 0x115   : > { %v1094_v50 = vpop.f32.mrf.mxu0  ;;  %v1142_v56 = vpop.f32.mrf.mxu1 }
 0x116   : > { %723 = vst [vmem:[%s1421_s4 + $0x48] sm:$0xff] %v1093_v48  ;;  %739 = vst [vmem:[%s1421_s4 + $0xc8] sm:$0xff] %v1474_v52  ;;  %v792_v27 = vmul.f32 %v1093_v48, %v1093_v48  ;;  %v754_v34 = vadd.f32 %v1093_v48, %v753_v25  ;;  %v802_v25 = vmul.f32 %v1441_v8, %v1441_v8 }
 0x117   : > { %v1095_v57 = vpop.f32.mrf.mxu0  ;;  %v1143_v63 = vpop.f32.mrf.mxu1 }
 0x118   : > { %v1096_v62 = vadd.f32 %v1095_v57, %v1094_v50  ;;  %v1479_v1 = vadd.f32 %v1143_v63, %v1142_v56  ;;  %v823_v38 = vadd.f32 %v822_v33, %v792_v27 }
 0x119   : > { %v1097_v0 = vpop.f32.mrf.mxu0  ;;  %v1145_v6 = vpop.f32.mrf.mxu1 }
 0x11a   : > { %724 = vst [vmem:[%s1421_s4 + $0x50] sm:$0xff] %v1096_v62  ;;  %740 = vst [vmem:[%s1421_s4 + $0xd0] sm:$0xff] %v1479_v1  ;;  %v793_v29 = vmul.f32 %v1096_v62, %v1096_v62  ;;  %v755_v40 = vadd.f32 %v1096_v62, %v754_v34 }
 0x11b   : > { %v1098_v7 = vpop.f32.mrf.mxu0  ;;  %v1146_v13 = vpop.f32.mrf.mxu1 }
 0x11c   : > { %v1099_v11 = vadd.f32 %v1098_v7, %v1097_v0  ;;  %v1484_v16 = vadd.f32 %v1146_v13, %v1145_v6  ;;  %v824_v45 = vadd.f32 %v823_v38, %v793_v29 }
 0x11d   : > { %v1100_v15 = vpop.f32.mrf.mxu0  ;;  %v1148_v21 = vpop.f32.mrf.mxu1 }
 0x11e   : > { %725 = vst [vmem:[%s1421_s4 + $0x58] sm:$0xff] %v1099_v11  ;;  %741 = vst [vmem:[%s1421_s4 + $0xd8] sm:$0xff] %v1484_v16  ;;  %v794_v41 = vmul.f32 %v1099_v11, %v1099_v11  ;;  %v756_v46 = vadd.f32 %v1099_v11, %v755_v40  ;;  %v799_v11 = vmul.f32 %v1425_v54, %v1425_v54 }
 0x11f   : > { %v1101_v22 = vpop.f32.mrf.mxu0  ;;  %v1149_v28 = vpop.f32.mrf.mxu1 }
 0x120   : > { %v1102_v23 = vadd.f32 %v1101_v22, %v1100_v15  ;;  %v1489_v31 = vadd.f32 %v1149_v28, %v1148_v21  ;;  %v825_v50 = vadd.f32 %v824_v45, %v794_v41  ;;  %v801_v21 = vmul.f32 %v1436_v2, %v1436_v2 }
 0x121   : > { %v1103_v30 = vpop.f32.mrf.mxu0  ;;  %v1151_v35 = vpop.f32.mrf.mxu1  ;;  %v809_v45 = vmul.f32 %v1479_v1, %v1479_v1 }
 0x122   : > { %726 = vst [vmem:[%s1421_s4 + $0x60] sm:$0xff] %v1102_v23  ;;  %742 = vst [vmem:[%s1421_s4 + $0xe0] sm:$0xff] %v1489_v31  ;;  %v795_v47 = vmul.f32 %v1102_v23, %v1102_v23  ;;  %v757_v53 = vadd.f32 %v1102_v23, %v756_v46 }
 0x123   : > { %v1104_v37 = vpop.f32.mrf.mxu0  ;;  %v1152_v42 = vpop.f32.mrf.mxu1 }
 0x124   : > { %v1105_v36 = vadd.f32 %v1104_v37, %v1103_v30  ;;  %v1494_v44 = vadd.f32 %v1152_v42, %v1151_v35  ;;  %v826_v59 = vadd.f32 %v825_v50, %v795_v47  ;;  %v810_v47 = vmul.f32 %v1484_v16, %v1484_v16 }
 0x125   : > { %v1106_v43 = vpop.f32.mrf.mxu0  ;;  %v1154_v48 = vpop.f32.mrf.mxu1 }
 0x126   : > { %727 = vst [vmem:[%s1421_s4 + $0x68] sm:$0xff] %v1105_v36  ;;  %743 = vst [vmem:[%s1421_s4 + $0xe8] sm:$0xff] %v1494_v44  ;;  %v796_v55 = vmul.f32 %v1105_v36, %v1105_v36  ;;  %v758_v61 = vadd.f32 %v1105_v36, %v757_v53  ;;  %v808_v36 = vmul.f32 %v1474_v52, %v1474_v52 }
 0x127   : > { %v1107_v49 = vpop.f32.mrf.mxu0  ;;  %v1155_v56 = vpop.f32.mrf.mxu1  ;;  %v812_v53 = vmul.f32 %v1494_v44, %v1494_v44 }
 0x128   : > { %v1108_v51 = vadd.f32 %v1107_v49, %v1106_v43  ;;  %v1156_v58 = vadd.f32 %v1155_v56, %v1154_v48  ;;  %v827_v3 = vadd.f32 %v826_v59, %v796_v55  ;;  %v811_v49 = vmul.f32 %v1489_v31, %v1489_v31 }
 0x129   : > { %v1109_v57 = vpop.f32.mrf.mxu0  ;;  %v1157_v63 = vpop.f32.mrf.mxu1 }
 0x12a   : > { %728 = vst [vmem:[%s1421_s4 + $0x70] sm:$0xff] %v1108_v51  ;;  %v797_v62 = vmul.f32 %v1108_v51, %v1108_v51  ;;  %744 = vst [vmem:[%s1421_s4 + $0xf0] sm:$0xff] %v1156_v58  ;;  %v759_v4 = vadd.f32 %v1108_v51, %v758_v61  ;;  %v813_v51 = vmul.f32 %v1156_v58, %v1156_v58 }
 0x12b   : > { %v1110_v0 = vpop.f32.mrf.mxu0  ;;  %v1158_v6 = vpop.f32.mrf.mxu1 }
 0x12c   : > { %v1111_v5 = vadd.f32 %v1110_v0, %v1109_v57  ;;  %v1159_v7 = vadd.f32 %v1158_v6, %v1157_v63  ;;  %v828_v9 = vadd.f32 %v827_v3, %v797_v62 }
 0x12e   : > { %729 = vst [vmem:[%s1421_s4 + $0x78] sm:$0xff] %v1111_v5  ;;  %v760_v10 = vadd.f32 %v1111_v5, %v759_v4  ;;  %v798_v12 = vmul.f32 %v1111_v5, %v1111_v5  ;;  %745 = vst [vmem:[%s1421_s4 + $0xf8] sm:$0xff] %v1159_v7  ;;  %v814_v59 = vmul.f32 %v1159_v7, %v1159_v7 }
 0x130   : > { %v761_v13 = vadd.f32 %v1425_v54, %v760_v10  ;;  %v829_v15 = vadd.f32 %v828_v9, %v798_v12  ;;  %v803_v54 = vmul.f32 %v1446_v14, %v1446_v14 }
 0x132   : > { %v762_v19 = vadd.f32 %v1431_v60, %v761_v13  ;;  %v830_v17 = vadd.f32 %v829_v15, %v799_v11  ;;  %v804_v60 = vmul.f32 %v1451_v20, %v1451_v20 }
 0x134   : > { %v763_v22 = vadd.f32 %v1436_v2, %v762_v19  ;;  %v831_v24 = vadd.f32 %v830_v17, %v800_v18  ;;  %v805_v2 = vmul.f32 %v1456_v26, %v1456_v26 }
 0x136   : > { %v764_v27 = vadd.f32 %v1441_v8, %v763_v22  ;;  %v832_v23 = vadd.f32 %v831_v24, %v801_v21  ;;  %v806_v8 = vmul.f32 %v1461_v32, %v1461_v32 }
 0x138   : > { %v833_v28 = vadd.f32 %v832_v23, %v802_v25  ;;  %v765_v30 = vadd.f32 %v1446_v14, %v764_v27  ;;  %v807_v14 = vmul.f32 %v1466_v39, %v1466_v39 }
 0x13a   : > { %v766_v33 = vadd.f32 %v1451_v20, %v765_v30  ;;  %v834_v34 = vadd.f32 %v833_v28, %v803_v54 }
 0x13c   : > { %v767_v29 = vadd.f32 %v1456_v26, %v766_v33  ;;  %v835_v35 = vadd.f32 %v834_v34, %v804_v60 }
 0x13e   : > { %v768_v37 = vadd.f32 %v1461_v32, %v767_v29  ;;  %v836_v38 = vadd.f32 %v835_v35, %v805_v2 }
 0x140   : > { %v769_v40 = vadd.f32 %v1466_v39, %v768_v37  ;;  %v837_v41 = vadd.f32 %v836_v38, %v806_v8 }
 0x142   : > { %v770_v20 = vadd.f32 %v1474_v52, %v769_v40  ;;  %v838_v42 = vadd.f32 %v837_v41, %v807_v14 }
 0x144   : > { %v839_v26 = vadd.f32 %v838_v42, %v808_v36  ;;  %v771_v43 = vadd.f32 %v1479_v1, %v770_v20 }
 0x146   : > { %v840_v32 = vadd.f32 %v839_v26, %v809_v45  ;;  %v772_v46 = vadd.f32 %v1484_v16, %v771_v43 }
 0x148   : > { %v841_v39 = vadd.f32 %v840_v32, %v810_v47  ;;  %v773_v48 = vadd.f32 %v1489_v31, %v772_v46 }
 0x14a   : > { %v842_v52 = vadd.f32 %v841_v39, %v811_v49  ;;  %v774_v50 = vadd.f32 %v1494_v44, %v773_v48 }
 0x14c   : > { %v843_v55 = vadd.f32 %v842_v52, %v812_v53  ;;  %v775_v1 = vadd.f32 %v1156_v58, %v774_v50 }
 0x14e   : > { %v844_v56 = vadd.f32 %v843_v55, %v813_v51  ;;  %v776_v57 = vadd.f32 %v1159_v7, %v775_v1 }
 0x150   : > { %v777_v16 = vrot.slane %v776_v57, 4  ;;  %v845_v61 = vadd.f32 %v844_v56, %v814_v59 }
 0x152   : > { %v778_v62 = vadd.f32 %v777_v16, %v776_v57  ;;  %v846_v63 = vrot.slane %v845_v61, 4 }
 0x154   : > { %v779_v0 = vrot.slane %v778_v62, 2  ;;  %v847_v3 = vadd.f32 %v846_v63, %v845_v61 }
 0x156   : > { %v780_v31 = vadd.f32 %v779_v0, %v778_v62  ;;  %v848_v4 = vrot.slane %v847_v3, 2 }
 0x158   : > { %v781_v5 = vrot.slane %v780_v31, 1  ;;  %v849_v6 = vadd.f32 %v848_v4, %v847_v3 }
 0x15a   : > { %v850_v9 = vrot.slane %v849_v6, 1  ;;  %v782_v44 = vadd.f32 %v781_v5, %v780_v31 }
 0x15c   : > { %v851_v58 = vadd.f32 %v850_v9, %v849_v6 }
 0x15e   : > { %v853_v7 = vsel %vm852_vm0, %v782_v44, %v851_v58 }
 0x15f   : > { %854 = vst [vmem:[%s231_s8] sm:$0x3] %v853_v7 }
 0x160 PF: > { %s14_s14 = sadd.s32 1, %s1286_s14   ;;  %s1562_s12 = smov %s1282_s13 }
 0x161   : > { %p11_p5 = scmp.ge.s32.totalorder %s14_s14, 4   ;;  %s1563_s13 = smov %s1565_s15 }
 0x163   :  { %13 = sbr.rel (!%p11_p5) target bundleno = 2 (0x2), region = 70 }

// kernel: content_encoder_forward.9
= control target key start
LH: loop header
LB: loop body
LE: loop exit
PB: predicated region body
PF: predicated region fallthrough
CT: control target
= control target key end

     0   :  { %s436_s9 = smov 0   ;;  %s438_s10 = smov 0   ;;  %s476_s0 = inlined_call_operand.vmem [shape: f32[2,64,128], index: 0, kind: input, shape index: {}]   ;;  %s477_s1 = inlined_call_operand.vmem [shape: f32[2,2,128], index: 1, kind: input, shape index: {}]   ;;  %s478_s2 = inlined_call_operand.vmem [shape: f32[2,64,128], index: 2, kind: output, shape index: {}]  }
   0x1   :  { %s440_s11 = smov 0  }
   0x2 LB: > { %s24_s12 = sadd.s32 1, %s415_s10  ;;  %p361_p0 = scmp.ge.s32.totalorder %s419_s11, 1  ;;  %s419_s11 = sphi %s440_s11, %s12_s11   ;;  %s415_s10 = sphi %s438_s10, %s480_s10   ;;  %s411_s9 = sphi %s436_s9, %s479_s9  }
   0x3   : > { %p26_p1 = scmp.ge.s32.totalorder %s24_s12, 2  ;;  %p142_p2 = scmp.lt.s32.totalorder %s419_s11, 3 }
   0x5   : > { %s482_s12 = smov (%p26_p1, %s24_s12), 0  ;;  %p143_p3 = pnand %p361_p0, %p142_p2 }
   0x6   : > { %p177_p4 = scmp.lt.s32.totalorder (!%p143_p3), %s411_s9, 1 }
   0x7   : > { %146 = sbr.rel (%p143_p3) target bundleno = 52 (0x34), region = 28 }
   0xc   : > { %s484_s9 = smov (!%p177_p4, %s411_s9), 1  ;;  %v218_v6 = vlaneseq }
   0xd   : > { %s364_s13 = sshll.u32 %s484_s9, 1  ;;  %s369_s17 = sshll.u32 %s484_s9, 6 }
   0xe   : > { %s189_s16 = scalar_lea.vmem %s477_s1, %s364_s13  ;;  %v219_v8 = vshrl.u32 %v218_v6, 7  ;;  %s184_s20 = scalar_lea.vmem %s476_s0, %s369_s17 }
   0xf   : > { %v208_v0 = vld [vmem:[%s189_s16] sm:$0x3]  ;;  %v201_v12 = vld [vmem:[%s184_s20 + $0x8] sm:$0xff]  ;;  %v202_v13 = vld [vmem:[%s184_s20 + $0x10] sm:$0xff]  ;;  %s198_s23 = scalar_lea.vmem %s478_s2, %s369_s17 }
  0x10   : > { %v209_v1 = vmul.f32 0.015625, %v208_v0  ;;  %v220_v9 = vsub.s32 0, %v219_v8  ;;  %v200_v10 = vld [vmem:[%s184_s20] sm:$0xff]  ;;  %v203_v14 = vld [vmem:[%s184_s20 + $0x18] sm:$0xff]  ;;  %v232_v16 = vsub.s32 1, %v219_v8  ;;  %v205_v17 = vld [vmem:[%s184_s20 + $0x28] sm:$0xff] }
  0x11   : > { %v204_v15 = vld [vmem:[%s184_s20 + $0x20] sm:$0xff]  ;;  %v206_v18 = vld [vmem:[%s184_s20 + $0x30] sm:$0xff]  ;;  %v207_v19 = vld [vmem:[%s184_s20 + $0x38] sm:$0xff] }
  0x12   : > { %v210_v2 = vmul.f32 %v209_v1, %v209_v1  ;;  %v221_v11 = vrot.slane %v209_v1, %v220_v9 }
  0x14   : > { %v212_v3 = vrot.slane %v210_v2, 7  ;;  %v222_v20 = vsub.f32 %v200_v10, %v221_v11  ;;  %v223_v21 = vsub.f32 %v201_v12, %v221_v11  ;;  %v224_v22 = vsub.f32 %v202_v13, %v221_v11 }
  0x15   : > { %v225_v23 = vsub.f32 %v203_v14, %v221_v11  ;;  %v226_v25 = vsub.f32 %v204_v15, %v221_v11  ;;  %v227_v26 = vsub.f32 %v205_v17, %v221_v11  ;;  %v228_v27 = vsub.f32 %v206_v18, %v221_v11 }
  0x16   : > { %v214_v4 = vsub.f32 %v209_v1, %v212_v3  ;;  %v229_v28 = vsub.f32 %v207_v19, %v221_v11 }
  0x18   : > { %v215_v5 = vmax.f32 %v214_v4, 0.0 }
  0x1a   : > { %v216_v7 = vadd.f32 1e-05, %v215_v5 }
  0x1c   : > { %395 = vrsqrt.f32 %v216_v7 }
  0x29   : > { %v396_v24 = vpop.eup %395 }
  0x2a   : > { %v233_v29 = vrot.slane %v396_v24, %v232_v16 }
  0x2c   : > { %v234_v30 = vmul.f32 %v233_v29, %v222_v20  ;;  %v235_v31 = vmul.f32 %v233_v29, %v223_v21  ;;  %v236_v32 = vmul.f32 %v233_v29, %v224_v22  ;;  %v237_v33 = vmul.f32 %v233_v29, %v225_v23 }
  0x2d   : > { %v238_v34 = vmul.f32 %v233_v29, %v226_v25  ;;  %v239_v35 = vmul.f32 %v233_v29, %v227_v26  ;;  %v240_v36 = vmul.f32 %v233_v29, %v228_v27  ;;  %v241_v37 = vmul.f32 %v233_v29, %v229_v28 }
  0x2e   : > { %v242_v38 = vmax.f32 %v234_v30, 0.0  ;;  %v243_v39 = vmax.f32 %v235_v31, 0.0  ;;  %v244_v40 = vmax.f32 %v236_v32, 0.0  ;;  %v245_v41 = vmax.f32 %v237_v33, 0.0 }
  0x2f   : > { %v246_v42 = vmax.f32 %v238_v34, 0.0  ;;  %v247_v43 = vmax.f32 %v239_v35, 0.0  ;;  %v248_v44 = vmax.f32 %v240_v36, 0.0  ;;  %v249_v45 = vmax.f32 %v241_v37, 0.0 }
  0x30   : > { %250 = vst [vmem:[%s198_s23] sm:$0xff] %v242_v38  ;;  %251 = vst [vmem:[%s198_s23 + $0x8] sm:$0xff] %v243_v39 }
  0x31   : > { %252 = vst [vmem:[%s198_s23 + $0x10] sm:$0xff] %v244_v40  ;;  %253 = vst [vmem:[%s198_s23 + $0x18] sm:$0xff] %v245_v41 }
  0x32   : > { %254 = vst [vmem:[%s198_s23 + $0x20] sm:$0xff] %v246_v42  ;;  %255 = vst [vmem:[%s198_s23 + $0x28] sm:$0xff] %v247_v43 }
  0x33   : > { %256 = vst [vmem:[%s198_s23 + $0x30] sm:$0xff] %v248_v44  ;;  %257 = vst [vmem:[%s198_s23 + $0x38] sm:$0xff] %v249_v45 }
  0x34 PF: > { %s12_s11 = sadd.s32 1, %s419_s11   ;;  %s479_s9 = smov %s415_s10 }
  0x35   : > { %p9_p5 = scmp.ge.s32.totalorder %s12_s11, 4   ;;  %s480_s10 = smov %s482_s12 }
  0x37   :  { %11 = sbr.rel (!%p9_p5) target bundleno = 2 (0x2), region = 61 }

// kernel: content_encoder_forward.8
= control target key start
LH: loop header
LB: loop body
LE: loop exit
PB: predicated region body
PF: predicated region fallthrough
CT: control target
= control target key end

     0   :  { %s840_s12 = smov 0   ;;  %s842_s13 = smov 0   ;;  %s952_s0 = inlined_call_operand.vmem [shape: bf16[2,64,256], index: 0, kind: input, shape index: {}]   ;;  %s953_s1 = inlined_call_operand.vmem [shape: bf16[256,128], index: 1, kind: input, shape index: {}]   ;;  %s954_s2 = inlined_call_operand.vmem [shape: f32[2,64,128], index: 2, kind: output, shape index: {0}]   ;;  %s955_s3 = inlined_call_operand.vmem [shape: f32[2,1,2,128], index: 3, kind: output, shape index: {1}]  }
   0x1   :  { %s844_s14 = smov 0  }
   0x2 LB: > { %s26_s15 = sadd.s32 1, %s814_s13  ;;  %p654_p0 = scmp.ge.s32.totalorder %s818_s14, 1  ;;  %s818_s14 = sphi %s844_s14, %s14_s14   ;;  %s814_s13 = sphi %s842_s13, %s957_s13   ;;  %s810_s12 = sphi %s840_s12, %s956_s12  }
   0x3   : > { %p28_p1 = scmp.ge.s32.totalorder %s26_s15, 2  ;;  %p164_p2 = scmp.lt.s32.totalorder %s818_s14, 3 }
   0x5   : > { %s959_s15 = smov (%p28_p1, %s26_s15), 0  ;;  %p165_p3 = pnand %p654_p0, %p164_p2 }
   0x6   : > { %p205_p4 = scmp.lt.s32.totalorder (!%p165_p3), %s810_s12, 1 }
   0x7   : > { %168 = sbr.rel (%p165_p3) target bundleno = 280 (0x118), region = 28 }
   0xc   : > { %v768_v0 = vld [vmem:[%s953_s1 + $0x78] sm:$0xff]   ;;  %v770_v2 = vld [vmem:[%s953_s1 + $0x70] sm:$0xff]   ;;  %v772_v4 = vld [vmem:[%s953_s1 + $0x68] sm:$0xff]   ;;  %s961_s12 = smov (!%p205_p4, %s810_s12), 1  ;;  %vm516_vm0 = vcmask 1040384  }
   0xd   : > { %v769_v1 = vld [vmem:[%s953_s1 + $0x38] sm:$0xff]   ;;  %688 = vmatprep.subr.bf16.mxu0 %v768_v0  ;;  %728 = vmatprep.subr.bf16.mxu1 %v768_v0  ;;  %v771_v3 = vld [vmem:[%s953_s1 + $0x30] sm:$0xff]   ;;  %v773_v5 = vld [vmem:[%s953_s1 + $0x28] sm:$0xff]   ;;  %s686_s5 = sshll.u32 %s961_s12, 6 }
   0xe   : > { %689 = vmatpush3.bf16.msra.mxu0 %v769_v1  ;;  %736 = vmatpush3.bf16.msra.mxu1 %v769_v1  ;;  %v774_v6 = vld [vmem:[%s953_s1 + $0x60] sm:$0xff]   ;;  %v776_v8 = vld [vmem:[%s953_s1 + $0x58] sm:$0xff]   ;;  %s893_s10 = scalar_lea.vmem %s952_s0, %s686_s5  ;;  %v778_v10 = vld [vmem:[%s953_s1 + $0x50] sm:$0xff]   ;;  %s929_s4 = scalar_lea.vmem %s954_s2, %s686_s5 }
   0xf   : > { %690 = vmatprep.subr.bf16.mxu0 %v770_v2  ;;  %729 = vmatprep.subr.bf16.mxu1 %v770_v2  ;;  %v775_v7 = vld [vmem:[%s953_s1 + $0x20] sm:$0xff]   ;;  %v777_v9 = vld [vmem:[%s953_s1 + $0x18] sm:$0xff]   ;;  %v779_v13 = vld [vmem:[%s953_s1 + $0x10] sm:$0xff]   ;;  %s659_s5 = sshll.u32 %s961_s12, 1 }
  0x10   : > { %v786_v11 = vld [vmem:[%s893_s10 + $0x4] ss:$8 sps:$4 sm:$0xff]   ;;  %v784_v18 = vld [vmem:[%s893_s10] ss:$8 sps:$4 sm:$0xff]   ;;  %v790_v20 = vld [vmem:[%s893_s10 + $0x14] ss:$8 sps:$4 sm:$0xff]   ;;  %s231_s8 = scalar_lea.vmem %s955_s3, %s659_s5 }
  0x11   : > { %v789_v12 = vld [vmem:[%s893_s10 + $0x24] ss:$8 sps:$4 sm:$0xff]   ;;  %441 = vmatprep.mubr.bf16.mxu0 %v786_v11  ;;  %v787_v19 = vld [vmem:[%s893_s10 + $0x20] ss:$8 sps:$4 sm:$0xff]   ;;  %v793_v21 = vld [vmem:[%s893_s10 + $0x34] ss:$8 sps:$4 sm:$0xff]  }
  0x12   : > { %691 = vmatpush3.bf16.msra.mxu0 %v771_v3  ;;  %737 = vmatpush3.bf16.msra.mxu1 %v771_v3  ;;  %v780_v14 = vld [vmem:[%s953_s1 + $0x48] sm:$0xff]   ;;  %v782_v16 = vld [vmem:[%s953_s1 + $0x40] sm:$0xff]   ;;  %v792_v22 = vld [vmem:[%s893_s10 + $0x10] ss:$8 sps:$4 sm:$0xff]  }
  0x13   : > { %692 = vmatprep.subr.bf16.mxu0 %v772_v4  ;;  %730 = vmatprep.subr.bf16.mxu1 %v772_v4  ;;  %v781_v15 = vld [vmem:[%s953_s1 + $0x8] sm:$0xff]   ;;  %v783_v17 = vld [vmem:[%s953_s1] sm:$0xff]   ;;  %v795_v23 = vld [vmem:[%s893_s10 + $0x30] ss:$8 sps:$4 sm:$0xff]  }
  0x14   : > { %457 = vmatprep.mubr.bf16.mxu1 %v789_v12 }
  0x16   : > { %693 = vmatpush3.bf16.msra.mxu0 %v773_v5  ;;  %738 = vmatpush3.bf16.msra.mxu1 %v773_v5 }
  0x17   : > { %694 = vmatprep.subr.bf16.mxu0 %v774_v6  ;;  %731 = vmatprep.subr.bf16.mxu1 %v774_v6 }
  0x1a   : > { %695 = vmatpush3.bf16.msra.mxu0 %v775_v7  ;;  %739 = vmatpush3.bf16.msra.mxu1 %v775_v7 }
  0x1b   : > { %696 = vmatprep.subr.bf16.mxu0 %v776_v8  ;;  %732 = vmatprep.subr.bf16.mxu1 %v776_v8 }
  0x1e   : > { %697 = vmatpush3.bf16.msra.mxu0 %v777_v9  ;;  %740 = vmatpush3.bf16.msra.mxu1 %v777_v9 }
  0x1f   : > { %698 = vmatprep.subr.bf16.mxu0 %v778_v10  ;;  %733 = vmatprep.subr.bf16.mxu1 %v778_v10 }
  0x22   : > { %699 = vmatpush3.bf16.msra.mxu0 %v779_v13  ;;  %741 = vmatpush3.bf16.msra.mxu1 %v779_v13 }
  0x23   : > { %700 = vmatprep.subr.bf16.mxu0 %v780_v14  ;;  %734 = vmatprep.subr.bf16.mxu1 %v780_v14 }
  0x26   : > { %701 = vmatpush3.bf16.msra.mxu0 %v781_v15  ;;  %742 = vmatpush3.bf16.msra.mxu1 %v781_v15 }
  0x27   : > { %702 = vmatprep.subr.bf16.mxu0 %v782_v16  ;;  %735 = vmatprep.subr.bf16.mxu1 %v782_v16 }
  0x2a   : > { %703 = vmatpush3.bf16.msra.mxu0 %v783_v17  ;;  %743 = vmatpush3.bf16.msra.mxu1 %v783_v17 }
  0x2d   : > { %442 = vmatmul.mubr.bf16.vlgmr.msra.gmra.mxu0 %v784_v18  ;;  %458 = vmatmul.mubr.bf16.vlgmr.msra.gmra.mxu1 %v787_v19 }
  0x2e   : > { %449 = vmatprep.mubr.bf16.mxu0 %v790_v20  ;;  %465 = vmatprep.mubr.bf16.mxu1 %v793_v21 }
  0x35   : > { %450 = vmatmul.mubr.bf16.gmra.mxu0 %v792_v22  ;;  %466 = vmatmul.mubr.bf16.gmra.mxu1 %v795_v23 }
  0xed   : > { %v704_v24 = vpop.f32.mrf.mxu0  ;;  %v716_v25 = vpop.f32.mrf.mxu1 }
  0xef   : > { %v705_v26 = vpop.f32.mrf.mxu0  ;;  %v717_v27 = vpop.f32.mrf.mxu1 }
  0xf0   : > { %v706_v28 = vadd.f32 %v705_v26, %v704_v24  ;;  %v718_v29 = vadd.f32 %v717_v27, %v716_v25 }
  0xf1   : > { %v707_v30 = vpop.f32.mrf.mxu0  ;;  %v719_v31 = vpop.f32.mrf.mxu1 }
  0xf2   : > { %474 = vst [vmem:[%s929_s4] sm:$0xff] %v706_v28  ;;  %478 = vst [vmem:[%s929_s4 + $0x20] sm:$0xff] %v718_v29  ;;  %v495_v45 = vmul.f32 %v706_v28, %v706_v28  ;;  %v499_v57 = vmul.f32 %v718_v29, %v718_v29 }
  0xf3   : > { %v708_v32 = vpop.f32.mrf.mxu0  ;;  %v720_v33 = vpop.f32.mrf.mxu1 }
  0xf4   : > { %v709_v34 = vadd.f32 %v708_v32, %v707_v30  ;;  %v721_v35 = vadd.f32 %v720_v33, %v719_v31 }
  0xf5   : > { %v710_v36 = vpop.f32.mrf.mxu0  ;;  %v722_v37 = vpop.f32.mrf.mxu1 }
  0xf6   : > { %475 = vst [vmem:[%s929_s4 + $0x8] sm:$0xff] %v709_v34  ;;  %479 = vst [vmem:[%s929_s4 + $0x28] sm:$0xff] %v721_v35  ;;  %v496_v40 = vmul.f32 %v709_v34, %v709_v34  ;;  %v482_v46 = vadd.f32 %v709_v34, %v706_v28  ;;  %v500_v60 = vmul.f32 %v721_v35, %v721_v35 }
  0xf7   : > { %v711_v38 = vpop.f32.mrf.mxu0  ;;  %v723_v39 = vpop.f32.mrf.mxu1 }
  0xf8   : > { %v712_v41 = vadd.f32 %v711_v38, %v710_v36  ;;  %v724_v42 = vadd.f32 %v723_v39, %v722_v37  ;;  %v503_v50 = vadd.f32 %v496_v40, %v495_v45 }
  0xf9   : > { %v713_v43 = vpop.f32.mrf.mxu0  ;;  %v725_v44 = vpop.f32.mrf.mxu1 }
  0xfa   : > { %476 = vst [vmem:[%s929_s4 + $0x10] sm:$0xff] %v712_v41  ;;  %v497_v47 = vmul.f32 %v712_v41, %v712_v41  ;;  %480 = vst [vmem:[%s929_s4 + $0x30] sm:$0xff] %v724_v42  ;;  %v483_v51 = vadd.f32 %v712_v41, %v482_v46  ;;  %v501_v63 = vmul.f32 %v724_v42, %v724_v42 }
  0xfb   : > { %v714_v48 = vpop.f32.mrf.mxu0  ;;  %v726_v49 = vpop.f32.mrf.mxu1 }
  0xfc   : > { %v715_v52 = vadd.f32 %v714_v48, %v713_v43  ;;  %v727_v53 = vadd.f32 %v726_v49, %v725_v44  ;;  %v504_v54 = vadd.f32 %v503_v50, %v497_v47 }
  0xfe   : > { %477 = vst [vmem:[%s929_s4 + $0x18] sm:$0xff] %v715_v52  ;;  %v484_v55 = vadd.f32 %v715_v52, %v483_v51  ;;  %v498_v56 = vmul.f32 %v715_v52, %v715_v52  ;;  %481 = vst [vmem:[%s929_s4 + $0x38] sm:$0xff] %v727_v53  ;;  %v502_v3 = vmul.f32 %v727_v53, %v727_v53 }
 0x100   : > { %v485_v58 = vadd.f32 %v718_v29, %v484_v55  ;;  %v505_v59 = vadd.f32 %v504_v54, %v498_v56 }
 0x102   : > { %v506_v61 = vadd.f32 %v505_v59, %v499_v57  ;;  %v486_v62 = vadd.f32 %v721_v35, %v485_v58 }
 0x104   : > { %v487_v0 = vadd.f32 %v724_v42, %v486_v62  ;;  %v507_v1 = vadd.f32 %v506_v61, %v500_v60 }
 0x106   : > { %v488_v2 = vadd.f32 %v727_v53, %v487_v0  ;;  %v508_v4 = vadd.f32 %v507_v1, %v501_v63 }
 0x108   : > { %v489_v5 = vrot.slane %v488_v2, 4  ;;  %v509_v6 = vadd.f32 %v508_v4, %v502_v3 }
 0x10a   : > { %v490_v7 = vadd.f32 %v489_v5, %v488_v2  ;;  %v510_v8 = vrot.slane %v509_v6, 4 }
 0x10c   : > { %v491_v9 = vrot.slane %v490_v7, 2  ;;  %v511_v10 = vadd.f32 %v510_v8, %v509_v6 }
 0x10e   : > { %v492_v11 = vadd.f32 %v491_v9, %v490_v7  ;;  %v512_v12 = vrot.slane %v511_v10, 2 }
 0x110   : > { %v493_v13 = vrot.slane %v492_v11, 1  ;;  %v513_v14 = vadd.f32 %v512_v12, %v511_v10 }
 0x112   : > { %v514_v15 = vrot.slane %v513_v14, 1  ;;  %v494_v16 = vadd.f32 %v493_v13, %v492_v11 }
 0x114   : > { %v515_v17 = vadd.f32 %v514_v15, %v513_v14 }
 0x116   : > { %v517_v18 = vsel %vm516_vm0, %v494_v16, %v515_v17 }
 0x117   : > { %518 = vst [vmem:[%s231_s8] sm:$0x3] %v517_v18 }
 0x118 PF: > { %s14_s14 = sadd.s32 1, %s818_s14   ;;  %s956_s12 = smov %s814_s13 }
 0x119   : > { %p11_p5 = scmp.ge.s32.totalorder %s14_s14, 4   ;;  %s957_s13 = smov %s959_s15 }
 0x11b   :  { %13 = sbr.rel (!%p11_p5) target bundleno = 2 (0x2), region = 70 }

// kernel: content_encoder_forward.11
= control target key start
LH: loop header
LB: loop body
LE: loop exit
PB: predicated region body
PF: predicated region fallthrough
CT: control target
= control target key end

     0   :  { %7 = vsyncpa [#allocation3], 0  ;;  %s613_s0 = inlined_call_operand.vmem [shape: f32[2,16,128], index: 0, kind: input, shape index: {}]   ;;  %s614_s1 = inlined_call_operand.vmem [shape: f32[2,2,128], index: 1, kind: input, shape index: {}]   ;;  %s615_s2 = inlined_call_operand.hbm [shape: f32[2,16,128], index: 2, kind: output, shape index: {}]  }
   0x1   :  { %9 = vsyncpa [#allocation3 + $0x1], 0  ;;  %s496_s9 = smov 0   ;;  %s498_s10 = smov 0  }
   0x2   :  { %s500_s11 = smov 0   ;;  %s502_s12 = smov 0  }
   0x3   :  { %s504_s13 = smov 0   ;;  %s506_s14 = smov 0  }
   0x4 LB: > { %s325_s15 = sadd.s32 4294967295, %s476_s14   ;;  %s326_s16 = sadd.s32 4294967294, %s476_s14   ;;  %s476_s14 = sphi %s506_s14, %s15_s14   ;;  %s472_s13 = sphi %s504_s13, %s622_s13   ;;  %s468_s12 = sphi %s502_s12, %s621_s12   ;;  %s464_s11 = sphi %s500_s11, %s620_s11   ;;  %s460_s10 = sphi %s498_s10, %s619_s10   ;;  %s456_s9 = sphi %s496_s9, %s618_s9  }
   0x5   : > { %s27_s17 = sadd.s32 1, %s472_s13  ;;  %s90_s18 = sadd.s32 1, %s464_s11 }
   0x6   : > { %p29_p0 = scmp.ge.s32.totalorder %s27_s17, 2  ;;  %p100_p1 = scmp.ne.s32.totalorder %s464_s11, %s460_s10 }
   0x7   : > { %p101_p2 = scmp.eq.s32.totalorder %s325_s15, 1  ;;  %p106_p3 = scmp.ne.s32.totalorder %s460_s10, %s456_s9 }
   0x8   : > { %s624_s17 = smov (%p29_p0, %s27_s17), 0  ;;  %p107_p5 = scmp.eq.s32.totalorder %s326_s16, 1 }
   0x9   : > { %p536_p4 = por %p101_p2, %p100_p1  ;;  %s85_s20 = ssub.s32 %s472_s13, %s624_s17 }
   0xa   : > { %p329_p6 = scmp.ge.s32.totalorder %s476_s14, 1  ;;  %p88_p7 = scmp.eq.s32.totalorder %s85_s20, 0 }
   0xb   : > { %p543_p8 = por %p107_p5, %p106_p3  ;;  %p145_p9 = scmp.lt.s32.totalorder %s476_s14, 3 }
   0xc   : > { %s549_s22 = scalar_select %p88_p7, %s464_s11, %s90_s18  }
   0xd   : > { %p146_p10 = pnand %p329_p6, %p145_p9 }
   0xe   : > { %p176_p11 = scmp.lt.s32.totalorder (!%p146_p10), %s468_s12, 1  ;;  %s172_s29 = sand.u32 (!%p146_p10), 1, %s460_s10  }
   0xf   : > { %149 = sbr.rel (%p146_p10) target bundleno = 71 (0x47), region = 28  ;;  %s330_s5 = sshll.u32 (!%p146_p10), %s172_s29, 4 }
  0x10   : > { %s174_s6 = scalar_lea.vmem (!%p146_p10), [#allocation2], %s330_s5  ;;  %s340_s8 = sshll.u32 (!%p146_p10), %s468_s12, 8 }
  0x11   : > { %s234_s7 = sshll.u32 (!%p146_p10), %s174_s6, 4  ;;  %s566_s18 = scalar_lea.hbm (!%p146_p10), %s615_s2, %s340_s8  ;;  %s561_s7 = int_to_ptr.vmem [resolvable:$true] %s234_s7 }
  0x12   : > { %s568_s20 = scalar_lea.sflag (!%p146_p10), [#allocation3], %s172_s29 }
  0x14   : > { %s177_s23 = scalar_select %p176_p11, %s468_s12, 1  ;;  %v202_v6 = vlaneseq }
  0x15   : > { %s478_s12 = smov [#allocation2]  }
  0x16   : > { %s333_s24 = sshll.u32 %s177_s23, 1  ;;  %v203_v8 = vshrl.u32 %v202_v6, 7  ;;  %s339_s28 = sshll.u32 %s177_s23, 4 }
  0x17   : > { %s188_s27 = scalar_lea.vmem %s614_s1, %s333_s24  ;;  %s183_s4 = scalar_lea.vmem %s613_s0, %s339_s28 }
  0x18   : > { %v192_v0 = vld [vmem:[%s188_s27] sm:$0x3]  ;;  %v204_v9 = vsub.s32 0, %v203_v8  ;;  %v191_v12 = vld [vmem:[%s183_s4 + $0x8] sm:$0xff]  ;;  %v210_v13 = vsub.s32 1, %v203_v8  ;;  %s400_s23 = scalar_lea.vmem %s561_s7, 256 }
  0x19   : > { %v193_v1 = vmul.f32 0.0625, %v192_v0  ;;  %v190_v11 = vld [vmem:[%s183_s4] sm:$0xff]  ;;  %p401_p12 = scmp.ne.s32.totalorder %s561_s7, %s400_s23  ;;  %s404_s24 = sshll.u32 %s478_s12, 4  ;;  %s405_s24 = int_to_ptr.vmem [resolvable:$false] %s404_s24 }
  0x1a   : > { %s406_s25 = scalar_lea.vmem %s405_s24, 512  ;;  %p407_p1 = scmp.lt.s32.totalorder %s561_s7, %s405_s24 }
  0x1b   : > { %v194_v2 = vmul.f32 %v193_v1, %v193_v1  ;;  %v205_v10 = vrot.slane %v193_v1, %v204_v9  ;;  %p402_p13 = pnand %p401_p12, %p536_p4  ;;  %p408_p2 = scmp.lt.s32.totalorder %s406_s25, %s400_s23 }
  0x1d   : > { %v196_v3 = vrot.slane %v194_v2, 7  ;;  %v206_v14 = vsub.f32 %v190_v11, %v205_v10  ;;  %v207_v15 = vsub.f32 %v191_v12, %v205_v10  ;;  %p403_p0 = pneg %p402_p13  ;;  %p409_p3 = por %p408_p2, %p407_p1 }
  0x1f   : > { %v198_v4 = vsub.f32 %v193_v1, %v196_v3  ;;  %p410_p5 = pnand %p409_p3, %p403_p0 }
  0x21   : > { %v199_v5 = vmax.f32 %v198_v4, 0.0 }
  0x23   : > { %v200_v7 = vadd.f32 1e-05, %v199_v5 }
  0x25   : > { %398 = vrsqrt.f32 %v200_v7 }
  0x32   : > { %v399_v16 = vpop.eup %398 }
  0x33   : > { %v211_v17 = vrot.slane %v399_v16, %v210_v13 }
  0x35   : > { %v212_v18 = vmul.f32 %v211_v17, %v206_v14  ;;  %v213_v19 = vmul.f32 %v211_v17, %v207_v15 }
  0x37   : > { %v214_v20 = vmax.f32 %v212_v18, 0.0  ;;  %v215_v21 = vmax.f32 %v213_v19, 0.0 }
  0x39   : > { %216 = vst [vmem:[%s174_s6] sm:$0xff] %v214_v20  ;;  %217 = vst [vmem:[%s174_s6 + $0x8] sm:$0xff] %v215_v21 }
  0x3a   : > { %413 = shalt.err (!%p410_p5)
}
  0x3b   : > { %s414_s26 = scalar_lea.hbm %s566_s18, 256  ;;  %s418_s29 = scalar_lea.hbm %s615_s2, 512 }
  0x3c   : > { %p415_p6 = scmp.ne.s32.totalorder %s566_s18, %s414_s26  ;;  %p419_p10 = scmp.lt.s32.totalorder %s566_s18, %s615_s2 }
  0x3d   : > { %p420_p11 = scmp.lt.s32.totalorder %s418_s29, %s414_s26 }
  0x3e   : > { %p416_p7 = pnand %p415_p6, %p536_p4 }
  0x3f   : > { %p421_p12 = por %p420_p11, %p419_p10 }
  0x40   : > { %p417_p9 = pneg %p416_p7 }
  0x42   : > { %p422_p13 = pnand %p421_p12, %p417_p9 }
  0x44   : > { %425 = shalt.err (!%p422_p13)
}
  0x45   : > { %s479_s4 = smov 128   ;;  %s480_s5 = smov 8  }
  0x46   : > { %341 = dma.vmem_to_hbm [thread:$0]  (%p536_p4), %s561_s7, 256, %s566_s18, %s568_s20, %s479_s4, %s479_s4, %s480_s5  }
  0x47 PF: > { %p347_p0 = scmp.ge.s32.totalorder %s476_s14, 2  ;;  %s249_s6 = sand.u32 1, %s456_s9  }
  0x48   : > { %s250_s8 = scalar_lea.sflag [#allocation3], %s249_s6 }
  0x49   : > { %p344_p1 = pnand %p347_p0, %p543_p8 }
  0x4b   : > { %p345_p2 = pneg %p344_p1 }
  0x4d   : > { %451 = dma.done.wait (%p345_p2), %s250_s8, 256  }
  0x4e   : > { %453 = vsyncadd (%p345_p2), %s250_s8, 4294967040  ;;  %s15_s14 = sadd.s32 1, %s476_s14   ;;  %s618_s9 = smov %s460_s10 }
  0x4f   : > { %p12_p3 = scmp.ge.s32.totalorder %s15_s14, 4   ;;  %s619_s10 = smov %s464_s11 }
  0x50   : > { %s620_s11 = smov %s549_s22  ;;  %s621_s12 = smov %s472_s13 }
  0x51   : > { %s622_s13 = smov %s624_s17  ;;  %14 = sbr.rel (!%p12_p3) target bundleno = 4 (0x4), region = 66 }
  0x56   :  { %255 = vsyncpa [#allocation3], 1 }
  0x57   :  { %257 = vsyncpa [#allocation3 + $0x1], 1 }

// kernel: content_encoder_forward.10
= control target key start
LH: loop header
LB: loop body
LE: loop exit
PB: predicated region body
PF: predicated region fallthrough
CT: control target
= control target key end

     0   :  { %s870_s12 = smov 0   ;;  %s872_s13 = smov 0   ;;  %s987_s0 = inlined_call_operand.vmem [shape: bf16[2,16,384], index: 0, kind: input, shape index: {}]   ;;  %s988_s1 = inlined_call_operand.vmem [shape: bf16[384,128], index: 1, kind: input, shape index: {}]   ;;  %s989_s2 = inlined_call_operand.vmem [shape: f32[2,16,128], index: 2, kind: output, shape index: {0}]   ;;  %s990_s3 = inlined_call_operand.vmem [shape: f32[2,1,2,128], index: 3, kind: output, shape index: {1}]  }
   0x1   :  { %s874_s14 = smov 0  }
   0x2 LB: > { %s26_s15 = sadd.s32 1, %s842_s13  ;;  %p683_p0 = scmp.ge.s32.totalorder %s846_s14, 1  ;;  %s846_s14 = sphi %s874_s14, %s14_s14   ;;  %s842_s13 = sphi %s872_s13, %s992_s13   ;;  %s838_s12 = sphi %s870_s12, %s991_s12  }
   0x3   : > { %p28_p1 = scmp.ge.s32.totalorder %s26_s15, 2  ;;  %p164_p2 = scmp.lt.s32.totalorder %s846_s14, 3 }
   0x5   : > { %s994_s15 = smov (%p28_p1, %s26_s15), 0  ;;  %p165_p3 = pnand %p683_p0, %p164_p2 }
   0x6   : > { %p205_p4 = scmp.lt.s32.totalorder (!%p165_p3), %s838_s12, 1 }
   0x7   : > { %168 = sbr.rel (%p165_p3) target bundleno = 267 (0x10b), region = 28 }
   0xc   : > { %v796_v0 = vld [vmem:[%s988_s1 + $0x78] sm:$0xff]   ;;  %v848_v1 = vmov 0.0   ;;  %vm849_vm0 = vmmov 0   ;;  %v799_v4 = vld [vmem:[%s988_s1 + $0x70] sm:$0xff]   ;;  %v802_v7 = vld [vmem:[%s988_s1 + $0x68] sm:$0xff]   ;;  %s996_s12 = smov (!%p205_p4, %s838_s12), 1 }
   0xd   : > { %749 = vmatprep.subr.bf16.mxu1 %v848_v1  ;;  %v797_v2 = vld [vmem:[%s988_s1 + $0xb8] sm:$0xff]   ;;  %718 = vmatprep.subr.bf16.mxu0 %v796_v0  ;;  %v800_v5 = vld [vmem:[%s988_s1 + $0xb0] sm:$0xff]   ;;  %v803_v8 = vld [vmem:[%s988_s1 + $0xa8] sm:$0xff]   ;;  %s769_s25 = smul.u32 24, %s996_s12  ;;  %s717_s22 = sshll.u32 %s996_s12, 4  ;;  %vm545_vm1 = vcmask 1040384  }
   0xe   : > { %v798_v3 = vld [vmem:[%s988_s1 + $0x38] sm:$0xff]   ;;  %765 = vmatprep.mubr.msk.bf16.mxu1 %vm849_vm0, %v848_v1  ;;  %750 = vmatpush3.bf16.msra.mxu1 %v797_v2  ;;  %v801_v6 = vld [vmem:[%s988_s1 + $0x30] sm:$0xff]   ;;  %v804_v9 = vld [vmem:[%s988_s1 + $0x28] sm:$0xff]   ;;  %s687_s26 = sshll.u32 %s996_s12, 1 }
   0xf   : > { %719 = vmatpush3.bf16.msra.mxu0 %v798_v3  ;;  %751 = vmatprep.subr.bf16.mxu1 %v848_v1  ;;  %v805_v10 = vld [vmem:[%s988_s1 + $0x60] sm:$0xff]   ;;  %v808_v13 = vld [vmem:[%s988_s1 + $0x58] sm:$0xff]   ;;  %v811_v16 = vld [vmem:[%s988_s1 + $0x50] sm:$0xff]   ;;  %s213_s9 = scalar_lea.vmem %s987_s0, %s769_s25  ;;  %s223_s25 = scalar_lea.vmem %s989_s2, %s717_s22 }
  0x10   : > { %720 = vmatprep.subr.bf16.mxu0 %v799_v4  ;;  %v806_v11 = vld [vmem:[%s988_s1 + $0xa0] sm:$0xff]   ;;  %v809_v14 = vld [vmem:[%s988_s1 + $0x98] sm:$0xff]   ;;  %v812_v17 = vld [vmem:[%s988_s1 + $0x90] sm:$0xff]   ;;  %s231_s29 = scalar_lea.vmem %s990_s3, %s687_s26 }
  0x11   : > { %v807_v12 = vld [vmem:[%s988_s1 + $0x20] sm:$0xff]   ;;  %v810_v15 = vld [vmem:[%s988_s1 + $0x18] sm:$0xff]   ;;  %v813_v18 = vld [vmem:[%s988_s1 + $0x10] sm:$0xff]  }
  0x12   : > { %752 = vmatpush3.bf16.msra.mxu1 %v800_v5  ;;  %v814_v19 = vld [vmem:[%s988_s1 + $0x48] sm:$0xff]   ;;  %v817_v22 = vld [vmem:[%s988_s1 + $0x40] sm:$0xff]  }
  0x13   : > { %721 = vmatpush3.bf16.msra.mxu0 %v801_v6  ;;  %753 = vmatprep.subr.bf16.mxu1 %v848_v1  ;;  %v815_v20 = vld [vmem:[%s988_s1 + $0x88] sm:$0xff]   ;;  %v822_v23 = vld [vmem:[%s213_s9 + $0x4] ss:$12 sps:$4 sm:$0xff]  }
  0x14   : > { %722 = vmatprep.subr.bf16.mxu0 %v802_v7  ;;  %v816_v21 = vld [vmem:[%s988_s1 + $0x8] sm:$0xff]   ;;  %v818_v24 = vld [vmem:[%s988_s1 + $0x80] sm:$0xff]   ;;  %477 = vmatprep.mubr.bf16.mxu0 %v822_v23 }
  0x15   : > { %v819_v25 = vld [vmem:[%s988_s1] sm:$0xff]   ;;  %v823_v26 = vld [vmem:[%s213_s9 + $0x8] ss:$12 sps:$4 sm:$0xff]  }
  0x16   : > { %754 = vmatpush3.bf16.msra.mxu1 %v803_v8  ;;  %v820_v27 = vld [vmem:[%s213_s9] ss:$12 sps:$4 sm:$0xff]  }
  0x17   : > { %723 = vmatpush3.bf16.msra.mxu0 %v804_v9  ;;  %755 = vmatprep.subr.bf16.mxu1 %v848_v1 }
  0x18   : > { %724 = vmatprep.subr.bf16.mxu0 %v805_v10 }
  0x1a   : > { %756 = vmatpush3.bf16.msra.mxu1 %v806_v11 }
  0x1b   : > { %725 = vmatpush3.bf16.msra.mxu0 %v807_v12  ;;  %757 = vmatprep.subr.bf16.mxu1 %v848_v1 }
  0x1c   : > { %726 = vmatprep.subr.bf16.mxu0 %v808_v13 }
  0x1e   : > { %758 = vmatpush3.bf16.msra.mxu1 %v809_v14 }
  0x1f   : > { %727 = vmatpush3.bf16.msra.mxu0 %v810_v15  ;;  %759 = vmatprep.subr.bf16.mxu1 %v848_v1 }
  0x20   : > { %728 = vmatprep.subr.bf16.mxu0 %v811_v16 }
  0x22   : > { %760 = vmatpush3.bf16.msra.mxu1 %v812_v17 }
  0x23   : > { %729 = vmatpush3.bf16.msra.mxu0 %v813_v18  ;;  %761 = vmatprep.subr.bf16.mxu1 %v848_v1 }
  0x24   : > { %730 = vmatprep.subr.bf16.mxu0 %v814_v19 }
  0x26   : > { %762 = vmatpush3.bf16.msra.mxu1 %v815_v20 }
  0x27   : > { %731 = vmatpush3.bf16.msra.mxu0 %v816_v21  ;;  %763 = vmatprep.subr.bf16.mxu1 %v848_v1 }
  0x28   : > { %732 = vmatprep.subr.bf16.mxu0 %v817_v22 }
  0x2a   : > { %764 = vmatpush3.bf16.msra.mxu1 %v818_v24 }
  0x2b   : > { %733 = vmatpush3.bf16.msra.mxu0 %v819_v25 }
  0x2d   : > { %766 = vmatmul.mubr.bf16.vlgmr.msra.gmra.mxu1 %v823_v26 }
  0x2e   : > { %478 = vmatmul.mubr.bf16.vlgmr.msra.gmra.mxu0 %v820_v27 }
  0xed   : > { %v520_v28 = vpop.f32.mrf.mxu1 }
  0xee   : > { %v734_v29 = vpop.f32.mrf.mxu0 }
  0xef   : > { %v767_v30 = vpop.f32.mrf.mxu1 }
  0xf0   : > { %v735_v31 = vpop.f32.mrf.mxu0 }
  0xf1   : > { %v736_v32 = vadd.f32 %v735_v31, %v734_v29  ;;  %v523_v33 = vpop.f32.mrf.mxu1 }
  0xf2   : > { %v737_v34 = vpop.f32.mrf.mxu0 }
  0xf3   : > { %v521_v35 = vadd.f32 %v736_v32, %v520_v28  ;;  %v768_v36 = vpop.f32.mrf.mxu1 }
  0xf4   : > { %v738_v37 = vpop.f32.mrf.mxu0 }
  0xf5   : > { %527 = vst [vmem:[%s223_s25] sm:$0xff] %v521_v35  ;;  %v739_v38 = vadd.f32 %v738_v37, %v737_v34  ;;  %v536_v40 = vmul.f32 %v521_v35, %v521_v35 }
  0xf7   : > { %v524_v39 = vadd.f32 %v739_v38, %v523_v33 }
  0xf9   : > { %528 = vst [vmem:[%s223_s25 + $0x8] sm:$0xff] %v524_v39  ;;  %v529_v41 = vadd.f32 %v524_v39, %v521_v35  ;;  %v537_v42 = vmul.f32 %v524_v39, %v524_v39 }
  0xfb   : > { %v530_v43 = vrot.slane %v529_v41, 4  ;;  %v538_v44 = vadd.f32 %v537_v42, %v536_v40 }
  0xfd   : > { %v531_v45 = vadd.f32 %v530_v43, %v529_v41  ;;  %v539_v46 = vrot.slane %v538_v44, 4 }
  0xff   : > { %v532_v47 = vrot.slane %v531_v45, 2  ;;  %v540_v48 = vadd.f32 %v539_v46, %v538_v44 }
 0x101   : > { %v533_v49 = vadd.f32 %v532_v47, %v531_v45  ;;  %v541_v50 = vrot.slane %v540_v48, 2 }
 0x103   : > { %v534_v51 = vrot.slane %v533_v49, 1  ;;  %v542_v52 = vadd.f32 %v541_v50, %v540_v48 }
 0x105   : > { %v543_v53 = vrot.slane %v542_v52, 1  ;;  %v535_v54 = vadd.f32 %v534_v51, %v533_v49 }
 0x107   : > { %v544_v55 = vadd.f32 %v543_v53, %v542_v52 }
 0x109   : > { %v546_v56 = vsel %vm545_vm1, %v535_v54, %v544_v55 }
 0x10a   : > { %547 = vst [vmem:[%s231_s29] sm:$0x3] %v546_v56 }
 0x10b PF: > { %s14_s14 = sadd.s32 1, %s846_s14   ;;  %s991_s12 = smov %s842_s13 }
 0x10c   : > { %p11_p5 = scmp.ge.s32.totalorder %s14_s14, 4   ;;  %s992_s13 = smov %s994_s15 }
 0x10e   :  { %13 = sbr.rel (!%p11_p5) target bundleno = 2 (0x2), region = 70 }

</bundles_post_ra>
